<compile_context>
chip_gen: v6e
topology: v6e:2x2x1
jax: 0.10.0
libtpu: 0.0.40
codegen_flags: <defaults>
</compile_context>

<pallas_src>
import jax
import jax.numpy as jnp
from jax.experimental import pallas as pl
from jax.experimental.pallas import tpu as pltpu


def _mlp_kernel(x_ref,
                w1_ref, b1_ref,
                w2_ref, b2_ref,
                w3_ref, b3_ref,
                w4_ref, b4_ref,
                w5_ref, b5_ref,
                out_ref):
    """Fused forward pass for one tile of the batch.

    All five GEMMs run back-to-back on the MXU with bf16 operands and f32
    accumulation; bias-add + ReLU stay in f32 on the VPU, everything in VMEM.
    """
    # Read each bias once (f32) and reuse.
    b1 = b1_ref[...]
    b2 = b2_ref[...]
    b3 = b3_ref[...]
    b4 = b4_ref[...]
    b5 = b5_ref[...]

    h = jnp.dot(x_ref[...], w1_ref[...], preferred_element_type=jnp.float32)
    h = jnp.maximum(h + b1, 0.0)

    h = jnp.dot(h.astype(jnp.bfloat16), w2_ref[...],
                preferred_element_type=jnp.float32)
    h = jnp.maximum(h + b2, 0.0)

    h = jnp.dot(h.astype(jnp.bfloat16), w3_ref[...],
                preferred_element_type=jnp.float32)
    h = jnp.maximum(h + b3, 0.0)

    h = jnp.dot(h.astype(jnp.bfloat16), w4_ref[...],
                preferred_element_type=jnp.float32)
    h = jnp.maximum(h + b4, 0.0)

    out = jnp.dot(h.astype(jnp.bfloat16), w5_ref[...],
                  preferred_element_type=jnp.float32) + b5   # no activation
    out_ref[...] = out.astype(out_ref.dtype)


def _default_batch_tile():
    """v5e: 128-row tiles already fill the 4x128 MXU; v6e/v7x: 256-wide MXU."""
    try:
        kind = jax.devices()[0].device_kind.lower()
    except Exception:  # pragma: no cover - be permissive about device query
        return 256
    if "v5" in kind:
        return 128
    return 256


def multitask3_forward(x, params, *, batch_tile=None):
    """params = dict with w1..w5 ([in, out], f32) and b1..b5 ([1, out], f32)."""
    B, F = x.shape
    T = params["w5"].shape[1]

    if batch_tile is None:
        batch_tile = _default_batch_tile()

    # --- batch tiling: avoid a wrapper-side pad copy whenever possible -------
    if B <= batch_tile:
        tb = max(8, -(-B // 8) * 8)       # single tile; only pad to sublane 8
        B_pad = tb
    else:
        tb = batch_tile
        B_pad = -(-B // tb) * tb
    if B_pad != B:
        x = jnp.pad(x, ((0, B_pad - B), (0, 0)))

    # --- bf16 fast path for MXU operands (halves weight/x DMA as well) -------
    x_bf16 = x.astype(jnp.bfloat16)
    w1 = params["w1"].astype(jnp.bfloat16)
    w2 = params["w2"].astype(jnp.bfloat16)
    w3 = params["w3"].astype(jnp.bfloat16)
    w4 = params["w4"].astype(jnp.bfloat16)
    w5 = params["w5"].astype(jnp.bfloat16)
    b1, b2, b3, b4, b5 = (params[f"b{i}"] for i in range(1, 6))

    # --- lane-pad the tiny T-wide output (and w5/b5) to a multiple of 128 ----
    T_pad = max(128, -(-T // 128) * 128)
    if T_pad != T:
        w5 = jnp.pad(w5, ((0, 0), (0, T_pad - T)))
        b5 = jnp.pad(b5, ((0, 0), (0, T_pad - T)))

    grid = (B_pad // tb,)

    def full_spec(shape):
        # whole-array block, same for every grid step (weights / biases)
        return pl.BlockSpec(shape, lambda i, _n=len(shape): (0,) * _n)

    in_specs = [
        pl.BlockSpec((tb, F), lambda i: (i, 0)),            # x
        full_spec(w1.shape), full_spec(b1.shape),
        full_spec(w2.shape), full_spec(b2.shape),
        full_spec(w3.shape), full_spec(b3.shape),
        full_spec(w4.shape), full_spec(b4.shape),
        full_spec(w5.shape), full_spec(b5.shape),
    ]
    out_spec = pl.BlockSpec((tb, T_pad), lambda i: (i, 0))

    out = pl.pallas_call(
        _mlp_kernel,
        out_shape=jax.ShapeDtypeStruct((B_pad, T_pad), jnp.float32),
        grid_spec=pltpu.PrefetchScalarGridSpec(
            num_scalar_prefetch=0,
            grid=grid,
            in_specs=in_specs,
            out_specs=out_spec,
        ),
        compiler_params=pltpu.CompilerParams(
            # parallel batch axis -> megacore/TC sharding on v7x
            dimension_semantics=("parallel",),
            # kernel footprint is ~a few MiB; 32 MiB is valid on v5e/v6e/v7x
            vmem_limit_bytes=32 * 1024 * 1024,
        ),
    )(x_bf16,
      w1, b1, w2, b2, w3, b3, w4, b4, w5, b5)

    return out[:B, :T]


def init_params(key, nu_features, nu_tasks):
    """Deterministic init mirroring nn.Linear shapes (weights pre-transposed)."""
    dims = [nu_features, 1024, 512, 256, 128, nu_tasks]
    params = {}
    for li in range(5):
        fan_in, fan_out = dims[li], dims[li + 1]
        key, kw, kb = jax.random.split(key, 3)
        bound = 1.0 / jnp.sqrt(fan_in)
        # PyTorch stores W as [out, in]; we store transposed [in, out].
        params[f"w{li + 1}"] = jax.random.uniform(
            kw, (fan_in, fan_out), jnp.float32, -bound, bound)
        params[f"b{li + 1}"] = jax.random.uniform(
            kb, (1, fan_out), jnp.float32, -bound, bound)
    return params


def _reference_forward_f32(x, params):
    h = x
    for li in range(1, 5):
        h = jnp.maximum(h @ params[f"w{li}"] + params[f"b{li}"], 0.0)
    return h @ params["w5"] + params["b5"]


def _reference_forward_bf16(x, params):
    """Same numerics as the kernel: bf16 matmul operands, f32 accumulation."""
    h = x
    for li in range(1, 6):
        a = h.astype(jnp.bfloat16)
        w = params[f"w{li}"].astype(jnp.bfloat16)
        h = jnp.dot(a, w, preferred_element_type=jnp.float32) + params[f"b{li}"]
        if li < 5:
            h = jnp.maximum(h, 0.0)
    return h


if __name__ == "__main__":
    key = jax.random.PRNGKey(0)
    nu_features, nu_tasks, batch = 32, 8, 2

    kx, kp = jax.random.split(key)
    x = jax.random.normal(kx, (batch, nu_features), jnp.float32)
    params = init_params(kp, nu_features, nu_tasks)

    out = multitask3_forward(x, params)
    out = jax.block_until_ready(out)
    assert out.shape == (batch, nu_tasks)

    ref_bf16 = _reference_forward_bf16(x, params)   # matches kernel numerics
    ref_f32 = _reference_forward_f32(x, params)     # original f32 semantics

    assert jnp.allclose(out, ref_bf16, atol=1e-2, rtol=1e-2), \
        "mismatch vs bf16-matched reference"
    assert jnp.allclose(out, ref_f32, atol=1e-1, rtol=1e-1), \
        "mismatch vs f32 reference"

    print("KERNEL_OK")
</pallas_src>

<mosaic_0001>
module attributes {stable_mosaic.version = 11 : i64} {
  func.func @_mlp_kernel(%arg0: i32, %arg1: memref<8x32xbf16, #tpu.memory_space<vmem>>, %arg2: memref<32x1024xbf16, #tpu.memory_space<vmem>>, %arg3: memref<1x1024xf32, #tpu.memory_space<vmem>>, %arg4: memref<1024x512xbf16, #tpu.memory_space<vmem>>, %arg5: memref<1x512xf32, #tpu.memory_space<vmem>>, %arg6: memref<512x256xbf16, #tpu.memory_space<vmem>>, %arg7: memref<1x256xf32, #tpu.memory_space<vmem>>, %arg8: memref<256x128xbf16, #tpu.memory_space<vmem>>, %arg9: memref<1x128xf32, #tpu.memory_space<vmem>>, %arg10: memref<128x128xbf16, #tpu.memory_space<vmem>>, %arg11: memref<1x128xf32, #tpu.memory_space<vmem>>, %arg12: memref<8x128xf32, #tpu.memory_space<vmem>>) attributes {dimension_semantics = [#tpu.dimension_semantics<parallel>], iteration_bounds = array<i64: 1>, scalar_prefetch = 0 : i64, scratch_operands = 0 : i64, tpu.core_type = #tpu.core_type<tc>, window_params = [{transform_indices = @transform_0, window_bounds = array<i64: 8, 32>}, {pipeline_mode = #tpu.pipeline_mode<synchronous>, transform_indices = @transform_1, window_bounds = array<i64: 32, 1024>}, {pipeline_mode = #tpu.pipeline_mode<synchronous>, transform_indices = @transform_2, window_bounds = array<i64: 1, 1024>}, {pipeline_mode = #tpu.pipeline_mode<synchronous>, transform_indices = @transform_3, window_bounds = array<i64: 1024, 512>}, {pipeline_mode = #tpu.pipeline_mode<synchronous>, transform_indices = @transform_4, window_bounds = array<i64: 1, 512>}, {pipeline_mode = #tpu.pipeline_mode<synchronous>, transform_indices = @transform_5, window_bounds = array<i64: 512, 256>}, {pipeline_mode = #tpu.pipeline_mode<synchronous>, transform_indices = @transform_6, window_bounds = array<i64: 1, 256>}, {pipeline_mode = #tpu.pipeline_mode<synchronous>, transform_indices = @transform_7, window_bounds = array<i64: 256, 128>}, {pipeline_mode = #tpu.pipeline_mode<synchronous>, transform_indices = @transform_8, window_bounds = array<i64: 1, 128>}, {pipeline_mode = #tpu.pipeline_mode<synchronous>, transform_indices = @transform_9, window_bounds = array<i64: 128, 128>}, {pipeline_mode = #tpu.pipeline_mode<synchronous>, transform_indices = @transform_10, window_bounds = array<i64: 1, 128>}, {transform_indices = @transform_11, window_bounds = array<i64: 8, 128>}]} {
    %c0 = arith.constant 0 : index
    %c0_0 = arith.constant 0 : index
    %0 = vector.load %arg3[%c0, %c0_0] : memref<1x1024xf32, #tpu.memory_space<vmem>>, vector<1x1024xf32>
    %c0_1 = arith.constant 0 : index
    %c0_2 = arith.constant 0 : index
    %1 = vector.load %arg5[%c0_1, %c0_2] : memref<1x512xf32, #tpu.memory_space<vmem>>, vector<1x512xf32>
    %c0_3 = arith.constant 0 : index
    %c0_4 = arith.constant 0 : index
    %2 = vector.load %arg7[%c0_3, %c0_4] : memref<1x256xf32, #tpu.memory_space<vmem>>, vector<1x256xf32>
    %c0_5 = arith.constant 0 : index
    %c0_6 = arith.constant 0 : index
    %3 = vector.load %arg9[%c0_5, %c0_6] : memref<1x128xf32, #tpu.memory_space<vmem>>, vector<1x128xf32>
    %c0_7 = arith.constant 0 : index
    %c0_8 = arith.constant 0 : index
    %4 = vector.load %arg11[%c0_7, %c0_8] : memref<1x128xf32, #tpu.memory_space<vmem>>, vector<1x128xf32>
    %c0_9 = arith.constant 0 : index
    %c0_10 = arith.constant 0 : index
    %5 = vector.load %arg1[%c0_9, %c0_10] : memref<8x32xbf16, #tpu.memory_space<vmem>>, vector<8x32xbf16>
    %c0_11 = arith.constant 0 : index
    %c0_12 = arith.constant 0 : index
    %6 = vector.load %arg2[%c0_11, %c0_12] : memref<32x1024xbf16, #tpu.memory_space<vmem>>, vector<32x1024xbf16>
    %cst = arith.constant dense<0.000000e+00> : vector<8x1024xf32>
    %7 = tpu.matmul %5, %6, %cst {dimension_numbers = #tpu.dot_dimension_numbers<[1], [0], [0], [1], [0, 0, 1, 1], [], []>} : vector<8x32xbf16>, vector<32x1024xbf16>, vector<8x1024xf32> -> vector<8x1024xf32>
    %8 = vector.broadcast %0 : vector<1x1024xf32> to vector<8x1024xf32>
    %9 = arith.addf %7, %8 : vector<8x1024xf32>
    %cst_13 = arith.constant 0.000000e+00 : f32
    %10 = vector.broadcast %cst_13 : f32 to vector<8x1024xf32>
    %11 = arith.maximumf %9, %10 : vector<8x1024xf32>
    %12 = arith.truncf %11 : vector<8x1024xf32> to vector<8x1024xbf16>
    %c0_14 = arith.constant 0 : index
    %c0_15 = arith.constant 0 : index
    %13 = vector.load %arg4[%c0_14, %c0_15] : memref<1024x512xbf16, #tpu.memory_space<vmem>>, vector<1024x512xbf16>
    %cst_16 = arith.constant dense<0.000000e+00> : vector<8x512xf32>
    %14 = tpu.matmul %12, %13, %cst_16 {dimension_numbers = #tpu.dot_dimension_numbers<[1], [0], [0], [1], [0, 0, 1, 1], [], []>} : vector<8x1024xbf16>, vector<1024x512xbf16>, vector<8x512xf32> -> vector<8x512xf32>
    %15 = vector.broadcast %1 : vector<1x512xf32> to vector<8x512xf32>
    %16 = arith.addf %14, %15 : vector<8x512xf32>
    %cst_17 = arith.constant 0.000000e+00 : f32
    %17 = vector.broadcast %cst_17 : f32 to vector<8x512xf32>
    %18 = arith.maximumf %16, %17 : vector<8x512xf32>
    %19 = arith.truncf %18 : vector<8x512xf32> to vector<8x512xbf16>
    %c0_18 = arith.constant 0 : index
    %c0_19 = arith.constant 0 : index
    %20 = vector.load %arg6[%c0_18, %c0_19] : memref<512x256xbf16, #tpu.memory_space<vmem>>, vector<512x256xbf16>
    %cst_20 = arith.constant dense<0.000000e+00> : vector<8x256xf32>
    %21 = tpu.matmul %19, %20, %cst_20 {dimension_numbers = #tpu.dot_dimension_numbers<[1], [0], [0], [1], [0, 0, 1, 1], [], []>} : vector<8x512xbf16>, vector<512x256xbf16>, vector<8x256xf32> -> vector<8x256xf32>
    %22 = vector.broadcast %2 : vector<1x256xf32> to vector<8x256xf32>
    %23 = arith.addf %21, %22 : vector<8x256xf32>
    %cst_21 = arith.constant 0.000000e+00 : f32
    %24 = vector.broadcast %cst_21 : f32 to vector<8x256xf32>
    %25 = arith.maximumf %23, %24 : vector<8x256xf32>
    %26 = arith.truncf %25 : vector<8x256xf32> to vector<8x256xbf16>
    %c0_22 = arith.constant 0 : index
    %c0_23 = arith.constant 0 : index
    %27 = vector.load %arg8[%c0_22, %c0_23] : memref<256x128xbf16, #tpu.memory_space<vmem>>, vector<256x128xbf16>
    %cst_24 = arith.constant dense<0.000000e+00> : vector<8x128xf32>
    %28 = tpu.matmul %26, %27, %cst_24 {dimension_numbers = #tpu.dot_dimension_numbers<[1], [0], [0], [1], [0, 0, 1, 1], [], []>} : vector<8x256xbf16>, vector<256x128xbf16>, vector<8x128xf32> -> vector<8x128xf32>
    %29 = vector.broadcast %3 : vector<1x128xf32> to vector<8x128xf32>
    %30 = arith.addf %28, %29 : vector<8x128xf32>
    %cst_25 = arith.constant 0.000000e+00 : f32
    %31 = vector.broadcast %cst_25 : f32 to vector<8x128xf32>
    %32 = arith.maximumf %30, %31 : vector<8x128xf32>
    %33 = arith.truncf %32 : vector<8x128xf32> to vector<8x128xbf16>
    %c0_26 = arith.constant 0 : index
    %c0_27 = arith.constant 0 : index
    %34 = vector.load %arg10[%c0_26, %c0_27] : memref<128x128xbf16, #tpu.memory_space<vmem>>, vector<128x128xbf16>
    %cst_28 = arith.constant dense<0.000000e+00> : vector<8x128xf32>
    %35 = tpu.matmul %33, %34, %cst_28 {dimension_numbers = #tpu.dot_dimension_numbers<[1], [0], [0], [1], [0, 0, 1, 1], [], []>} : vector<8x128xbf16>, vector<128x128xbf16>, vector<8x128xf32> -> vector<8x128xf32>
    %36 = vector.broadcast %4 : vector<1x128xf32> to vector<8x128xf32>
    %37 = arith.addf %35, %36 : vector<8x128xf32>
    %c0_29 = arith.constant 0 : index
    %c0_30 = arith.constant 0 : index
    %38 = vector.load %arg12[%c0_29, %c0_30] : memref<8x128xf32, #tpu.memory_space<vmem>>, vector<8x128xf32>
    tpu.vector_store %arg12[%c0_29, %c0_30], %37 {strides = array<i32>} : memref<8x128xf32, #tpu.memory_space<vmem>>, vector<8x128xf32>,
    return
  }
  func.func @transform_0(%arg0: i32) -> (i32, i32) {
    %c0_i32 = arith.constant 0 : i32
    %c0_i32_0 = arith.constant 0 : i32
    return %arg0, %c0_i32 : i32, i32
  }
  func.func @transform_1(%arg0: i32) -> (i32, i32) {
    %c0_i32 = arith.constant 0 : i32
    %c0_i32_0 = arith.constant 0 : i32
    %c0_i32_1 = arith.constant 0 : i32
    return %c0_i32, %c0_i32_0 : i32, i32
  }
  func.func @transform_2(%arg0: i32) -> (i32, i32) {
    %c0_i32 = arith.constant 0 : i32
    %c0_i32_0 = arith.constant 0 : i32
    %c0_i32_1 = arith.constant 0 : i32
    return %c0_i32, %c0_i32_0 : i32, i32
  }
  func.func @transform_3(%arg0: i32) -> (i32, i32) {
    %c0_i32 = arith.constant 0 : i32
    %c0_i32_0 = arith.constant 0 : i32
    %c0_i32_1 = arith.constant 0 : i32
    return %c0_i32, %c0_i32_0 : i32, i32
  }
  func.func @transform_4(%arg0: i32) -> (i32, i32) {
    %c0_i32 = arith.constant 0 : i32
    %c0_i32_0 = arith.constant 0 : i32
    %c0_i32_1 = arith.constant 0 : i32
    return %c0_i32, %c0_i32_0 : i32, i32
  }
  func.func @transform_5(%arg0: i32) -> (i32, i32) {
    %c0_i32 = arith.constant 0 : i32
    %c0_i32_0 = arith.constant 0 : i32
    %c0_i32_1 = arith.constant 0 : i32
    return %c0_i32, %c0_i32_0 : i32, i32
  }
  func.func @transform_6(%arg0: i32) -> (i32, i32) {
    %c0_i32 = arith.constant 0 : i32
    %c0_i32_0 = arith.constant 0 : i32
    %c0_i32_1 = arith.constant 0 : i32
    return %c0_i32, %c0_i32_0 : i32, i32
  }
  func.func @transform_7(%arg0: i32) -> (i32, i32) {
    %c0_i32 = arith.constant 0 : i32
    %c0_i32_0 = arith.constant 0 : i32
    %c0_i32_1 = arith.constant 0 : i32
    return %c0_i32, %c0_i32_0 : i32, i32
  }
  func.func @transform_8(%arg0: i32) -> (i32, i32) {
    %c0_i32 = arith.constant 0 : i32
    %c0_i32_0 = arith.constant 0 : i32
    %c0_i32_1 = arith.constant 0 : i32
    return %c0_i32, %c0_i32_0 : i32, i32
  }
  func.func @transform_9(%arg0: i32) -> (i32, i32) {
    %c0_i32 = arith.constant 0 : i32
    %c0_i32_0 = arith.constant 0 : i32
    %c0_i32_1 = arith.constant 0 : i32
    return %c0_i32, %c0_i32_0 : i32, i32
  }
  func.func @transform_10(%arg0: i32) -> (i32, i32) {
    %c0_i32 = arith.constant 0 : i32
    %c0_i32_0 = arith.constant 0 : i32
    %c0_i32_1 = arith.constant 0 : i32
    return %c0_i32, %c0_i32_0 : i32, i32
  }
  func.func @transform_11(%arg0: i32) -> (i32, i32) {
    %c0_i32 = arith.constant 0 : i32
    %c0_i32_0 = arith.constant 0 : i32
    return %arg0, %c0_i32 : i32, i32
  }
}

</mosaic_0001>

<bundles_post_ra>
// kernel: tpu_custom_call.1
= control target key start
LH: loop header
LB: loop body
LE: loop exit
PB: predicated region body
PF: predicated region fallthrough
CT: control target
= control target key end

     0   :  { %16 = vsyncpa [#allocation3], 0  ;;  %s4466_s0 = inlined_call_operand.hbm [shape: bf16[8,32], index: 0, kind: input, shape index: {}]   ;;  %s4467_s1 = inlined_call_operand.hbm [shape: bf16[32,1024], index: 1, kind: input, shape index: {}]   ;;  %s4468_s2 = inlined_call_operand.hbm [shape: f32[1,1024], index: 2, kind: input, shape index: {}]   ;;  %s4469_s3 = inlined_call_operand.hbm [shape: bf16[1024,512], index: 3, kind: input, shape index: {}]   ;;  %s4470_s4 = inlined_call_operand.vmem [shape: f32[1,512], index: 4, kind: input, shape index: {}]   ;;  %s4471_s5 = inlined_call_operand.hbm [shape: bf16[512,256], index: 5, kind: input, shape index: {}]   ;;  %s4472_s6 = inlined_call_operand.vmem [shape: f32[1,256], index: 6, kind: input, shape index: {}]   ;;  %s4473_s7 = inlined_call_operand.hbm [shape: bf16[256,128], index: 7, kind: input, shape index: {}]   ;;  %s4474_s8 = inlined_call_operand.vmem [shape: f32[1,128], index: 8, kind: input, shape index: {}]   ;;  %s4475_s9 = inlined_call_operand.hbm [shape: bf16[128,128], index: 9, kind: input, shape index: {}]   ;;  %s4476_s10 = inlined_call_operand.vmem [shape: f32[1,128], index: 10, kind: input, shape index: {}]   ;;  %s4477_s11 = inlined_call_operand.hbm [shape: f32[8,128], index: 11, kind: output, shape index: {}]  }
   0x1   :  { %17 = vsyncpa [#allocation6], 0 }
   0x2   :  { %18 = vsyncpa [#allocation9], 0 }
   0x3   :  { %19 = vsyncpa [#allocation12], 0 }
   0x4   :  { %20 = vsyncpa [#allocation4], 0  ;;  %s4247_s17 = smov [#allocation5]  }
   0x5   :  { %s36_s18 = sshll.u32 %s4247_s17, 4  ;;  %s37_s18 = int_to_ptr.vmem [resolvable:$true] %s36_s18 }
   0x6   :  { %s4085_s19 = scalar_lea.vmem %s37_s18, 2048  ;;  %p4090_p1 = scmp.lt.s32.totalorder %s37_s18, %s37_s18 }
   0x7   :  { %p4086_p0 = scmp.ne.s32.totalorder %s37_s18, %s4085_s19  ;;  %p4091_p2 = scmp.lt.s32.totalorder %s4085_s19, %s4085_s19 }
   0x9   :  { %p4092_p3 = por %p4091_p2, %p4090_p1 }
   0xb   :  { %p4093_p4 = pnand %p4092_p3, %p4086_p0 }
   0xd   :  { %4096 = shalt.err (!%p4093_p4)
}
   0xe   :  { %s4248_s20 = smov 512   ;;  %s4249_s21 = smov 32  }
   0xf   :  { %42 = dma.hbm_to_vmem [thread:$0]  %s4467_s1, 2048, %s37_s18, [#allocation6], %s4248_s20, %s4248_s20, %s4249_s21  }
  0x10   :  { %s4250_s24 = smov [#allocation8]  }
  0x11   :  { %s58_s25 = sshll.u32 %s4250_s24, 4  ;;  %s59_s25 = int_to_ptr.vmem [resolvable:$true] %s58_s25 }
  0x12   :  { %s4105_s26 = scalar_lea.vmem %s59_s25, 32768  ;;  %p4110_p6 = scmp.lt.s32.totalorder %s59_s25, %s59_s25 }
  0x13   :  { %p4106_p5 = scmp.ne.s32.totalorder %s59_s25, %s4105_s26  ;;  %p4111_p7 = scmp.lt.s32.totalorder %s4105_s26, %s4105_s26 }
  0x15   :  { %p4112_p8 = por %p4111_p7, %p4110_p6 }
  0x17   :  { %p4113_p9 = pnand %p4112_p8, %p4106_p5 }
  0x19   :  { %4116 = shalt.err (!%p4113_p9)
}
  0x1a   :  { %s4251_s27 = smov 256   ;;  %s4252_s28 = smov 16  }
  0x1b   :  { %64 = dma.hbm_to_vmem [thread:$0]  %s4469_s3, 32768, %s59_s25, [#allocation9], %s4251_s27, %s4251_s27, %s4252_s28  }
  0x1c   :  { %s4253_s12 = smov [#allocation11]  }
  0x1d   :  { %s86_s13 = sshll.u32 %s4253_s12, 4  ;;  %s87_s13 = int_to_ptr.vmem [resolvable:$true] %s86_s13 }
  0x1e   :  { %s4125_s1 = scalar_lea.vmem %s87_s13, 2048  ;;  %p4130_p11 = scmp.lt.s32.totalorder %s87_s13, %s87_s13 }
  0x1f   :  { %p4126_p10 = scmp.ne.s32.totalorder %s87_s13, %s4125_s1  ;;  %p4131_p12 = scmp.lt.s32.totalorder %s4125_s1, %s4125_s1 }
  0x21   :  { %p4132_p13 = por %p4131_p12, %p4130_p11 }
  0x23   :  { %p4133_p0 = pnand %p4132_p13, %p4126_p10 }
  0x25   :  { %4136 = shalt.err (!%p4133_p0)
}
  0x26   :  { %s4254_s14 = smov 64   ;;  %s4255_s15 = smov 4  }
  0x27   :  { %92 = dma.hbm_to_vmem [thread:$0]  %s4473_s7, 2048, %s87_s13, [#allocation12], %s4254_s14, %s4254_s14, %s4255_s15  }
  0x28   :  { %s4256_s3 = smov [#allocation2]   ;;  %s4257_s19 = smov [#allocation7]  }
  0x29   :  { %s27_s18 = sshll.u32 %s4256_s3, 4  ;;  %s49_s20 = sshll.u32 %s4257_s19, 4  ;;  %s28_s18 = int_to_ptr.vmem [resolvable:$true] %s27_s18  ;;  %s50_s20 = int_to_ptr.vmem [resolvable:$true] %s49_s20 }
  0x2a   :  { %s4145_s21 = scalar_lea.vmem %s28_s18, 64  ;;  %p4150_p2 = scmp.lt.s32.totalorder %s28_s18, %s28_s18 }
  0x2b   :  { %p4146_p1 = scmp.ne.s32.totalorder %s28_s18, %s4145_s21  ;;  %p4151_p3 = scmp.lt.s32.totalorder %s4145_s21, %s4145_s21 }
  0x2d   :  { %p4152_p4 = por %p4151_p3, %p4150_p2 }
  0x2f   :  { %p4153_p5 = pnand %p4152_p4, %p4146_p1 }
  0x31   :  { %4156 = shalt.err (!%p4153_p5)
}
  0x32   :  { %30 = dma.hbm_to_vmem [thread:$0]  %s4466_s0, 64, %s28_s18, [#allocation3]  }
  0x33   :  { %s4165_s24 = scalar_lea.vmem %s50_s20, 128  ;;  %p4170_p7 = scmp.lt.s32.totalorder %s50_s20, %s50_s20 }
  0x34   :  { %p4166_p6 = scmp.ne.s32.totalorder %s50_s20, %s4165_s24  ;;  %p4171_p8 = scmp.lt.s32.totalorder %s4165_s24, %s4165_s24 }
  0x36   :  { %p4172_p9 = por %p4171_p8, %p4170_p7 }
  0x38   :  { %p4173_p10 = pnand %p4172_p9, %p4166_p6 }
  0x3a   :  { %4176 = shalt.err (!%p4173_p10)
}
  0x3b   :  { %52 = dma.hbm_to_vmem [thread:$0]  %s4468_s2, 128, %s50_s20, [#allocation6]  }
  0x3c   :  { %s4258_s26 = smov [#allocation10]  }
  0x3d   :  { %s72_s27 = sshll.u32 %s4258_s26, 4  ;;  %s73_s27 = int_to_ptr.vmem [resolvable:$true] %s72_s27 }
  0x3e   :  { %s4185_s28 = scalar_lea.vmem %s73_s27, 8192  ;;  %p4190_p12 = scmp.lt.s32.totalorder %s73_s27, %s73_s27 }
  0x3f   :  { %p4186_p11 = scmp.ne.s32.totalorder %s73_s27, %s4185_s28  ;;  %p4191_p13 = scmp.lt.s32.totalorder %s4185_s28, %s4185_s28 }
  0x41   :  { %p4192_p0 = por %p4191_p13, %p4190_p12 }
  0x43   :  { %p4193_p1 = pnand %p4192_p0, %p4186_p11 }
  0x45   :  { %4196 = shalt.err (!%p4193_p1)
}
  0x46   :  { %s4259_s0 = smov 128   ;;  %s4260_s29 = smov 8  }
  0x47   :  { %78 = dma.hbm_to_vmem [thread:$0]  %s4471_s5, 8192, %s73_s27, [#allocation9], %s4259_s0, %s4259_s0, %s4260_s29  }
  0x48   :  { %s4261_s13 = smov [#allocation13]  }
  0x49   :  { %s100_s1 = sshll.u32 %s4261_s13, 4  ;;  %s101_s1 = int_to_ptr.vmem [resolvable:$true] %s100_s1 }
  0x4a   :  { %s4205_s2 = scalar_lea.vmem %s101_s1, 1024  ;;  %p4210_p3 = scmp.lt.s32.totalorder %s101_s1, %s101_s1 }
  0x4b   :  { %p4206_p2 = scmp.ne.s32.totalorder %s101_s1, %s4205_s2  ;;  %p4211_p4 = scmp.lt.s32.totalorder %s4205_s2, %s4205_s2 }
  0x4d   :  { %p4212_p5 = por %p4211_p4, %p4210_p3 }
  0x4f   :  { %p4213_p6 = pnand %p4212_p5, %p4206_p2 }
  0x51   :  { %4216 = shalt.err (!%p4213_p6)
}
  0x52   :  { %106 = dma.hbm_to_vmem [thread:$0]  %s4475_s9, 1024, %s101_s1, [#allocation12], %s4254_s14, %s4254_s14, %s4255_s15  }
  0x53   :  { %4237 = dma.done.wait [#allocation3], 64  }
  0x54   :  { %4238 = vsyncadd [#allocation3], 4294967232 }
  0x55   :  { %4239 = dma.done.wait [#allocation6], 2176  }
  0x56   :  { %4240 = vsyncadd [#allocation6], 4294965120 }
  0x57   :  { %4241 = dma.done.wait [#allocation9], 40960  }
  0x58   :  { %4242 = vsyncadd [#allocation9], 4294926336 }
  0x59   :  { %4243 = dma.done.wait [#allocation12], 3072  }
  0x5a   :  { %4244 = vsyncadd [#allocation12], 4294964224  ;;  %v4262_v0 = vmov 0   ;;  %v145_v1 = vld [vmem:[#allocation5 + $0x40] sm:$0xff]  ;;  %v146_v3 = vld [vmem:[#allocation5 + $0x48] sm:$0xff]  ;;  %vm274_vm0 = vcmask 261120  }
  0x5b   :  { %310 = vmatprep.mubr.bf16.mxu0 %v4262_v0  ;;  %351 = vmatprep.mubr.bf16.mxu1 %v4262_v0  ;;  %v149_v2 = vld [vmem:[#allocation5 + $0x60] sm:$0xff]  ;;  %v150_v5 = vld [vmem:[#allocation5 + $0x68] sm:$0xff]  ;;  %v147_v15 = vld [vmem:[#allocation5 + $0x50] sm:$0xff]  ;;  %vm4264_vm1 = vmmov 0   ;;  %s4265_s19 = smov [#allocation14]  }
  0x5c   :  { %v3146_v4 = vcombine.high %v145_v1, %v149_v2  ;;  %v3145_v6 = vcombine.low %v145_v1, %v149_v2  ;;  %v137_v7 = vld [vmem:[#allocation5] sm:$0xff]  ;;  %v3148_v9 = vcombine.high %v146_v3, %v150_v5  ;;  %v3147_v10 = vcombine.low %v146_v3, %v150_v5  ;;  %v138_v12 = vld [vmem:[#allocation5 + $0x8] sm:$0xff]  ;;  %v151_v16 = vld [vmem:[#allocation5 + $0x70] sm:$0xff]  ;;  %s3125_s20 = sshll.u32 %s4265_s19, 4  ;;  %s3126_s20 = int_to_ptr.vmem [resolvable:$true] %s3125_s20 }
  0x5d   :  { %v141_v8 = vld [vmem:[#allocation5 + $0x20] sm:$0xff]  ;;  %v142_v13 = vld [vmem:[#allocation5 + $0x28] sm:$0xff]  ;;  %v148_v17 = vld [vmem:[#allocation5 + $0x58] sm:$0xff]  ;;  %v3150_v21 = vcombine.high %v147_v15, %v151_v16  ;;  %v3149_v28 = vcombine.low %v147_v15, %v151_v16  ;;  %p4222_p8 = scmp.lt.s32.totalorder %s3126_s20, %s3126_s20 }
  0x5e   :  { %v3138_v11 = vcombine.high %v137_v7, %v141_v8  ;;  %290 = vmatprep.subr.bf16.mxu0 %v3146_v4  ;;  %v3140_v14 = vcombine.high %v138_v12, %v142_v13  ;;  %331 = vmatprep.subr.bf16.mxu1 %v3148_v9  ;;  %v3137_v18 = vcombine.low %v137_v7, %v141_v8  ;;  %v152_v19 = vld [vmem:[#allocation5 + $0x78] sm:$0xff]  ;;  %v139_v22 = vld [vmem:[#allocation5 + $0x10] sm:$0xff] }
  0x5f   :  { %291 = vmatpush1.bf16.msra.mxu0 %v3145_v6  ;;  %332 = vmatpush1.bf16.msra.mxu1 %v3147_v10  ;;  %v3139_v20 = vcombine.low %v138_v12, %v142_v13  ;;  %v3152_v23 = vcombine.high %v148_v17, %v152_v19  ;;  %v143_v24 = vld [vmem:[#allocation5 + $0x30] sm:$0xff]  ;;  %v140_v25 = vld [vmem:[#allocation5 + $0x18] sm:$0xff]  ;;  %v3151_v29 = vcombine.low %v148_v17, %v152_v19 }
  0x60   :  { %292 = vmatprep.subr.bf16.mxu0 %v3138_v11  ;;  %333 = vmatprep.subr.bf16.mxu1 %v3140_v14  ;;  %v144_v26 = vld [vmem:[#allocation5 + $0x38] sm:$0xff]  ;;  %v3142_v30 = vcombine.high %v139_v22, %v143_v24  ;;  %v3141_v32 = vcombine.low %v139_v22, %v143_v24 }
  0x61   :  { %v136_v27 = vld [vmem:[#allocation2] sm:$0xf]  ;;  %v3144_v31 = vcombine.high %v140_v25, %v144_v26  ;;  %v3143_v33 = vcombine.low %v140_v25, %v144_v26  ;;  %v3573_v36 = vld [vmem:[#allocation8 + $0xe0] ss:$16 sps:$4 sm:$0xff]  }
  0x62   :  { %v3575_v34 = vld [vmem:[#allocation8 + $0xe4] ss:$16 sps:$4 sm:$0xff]   ;;  %v3576_v37 = vld [vmem:[#allocation8 + $0x2e0] ss:$16 sps:$4 sm:$0xff]  }
  0x63   :  { %293 = vmatpush1.bf16.msra.mxu0 %v3137_v18  ;;  %334 = vmatpush1.bf16.msra.mxu1 %v3139_v20  ;;  %v3578_v35 = vld [vmem:[#allocation8 + $0x2e4] ss:$16 sps:$4 sm:$0xff]   ;;  %v3579_v40 = vld [vmem:[#allocation8 + $0xc0] ss:$16 sps:$4 sm:$0xff]  }
  0x64   :  { %372 = vmatprep.subr.bf16.mxu0 %v3150_v21  ;;  %413 = vmatprep.subr.bf16.mxu1 %v3152_v23  ;;  %v3581_v38 = vld [vmem:[#allocation8 + $0xc4] ss:$16 sps:$4 sm:$0xff]   ;;  %v3582_v41 = vld [vmem:[#allocation8 + $0x2c0] ss:$16 sps:$4 sm:$0xff]  }
  0x65   :  { %v3584_v39 = vld [vmem:[#allocation8 + $0x2c4] ss:$16 sps:$4 sm:$0xff]   ;;  %v3585_v44 = vld [vmem:[#allocation8 + $0xa0] ss:$16 sps:$4 sm:$0xff]  }
  0x66   :  { %3153 = vmatmul.mubr.msk.bf16.vlgmr.msra.gmra.mxu0 %vm274_vm0, %v136_v27  ;;  %3154 = vmatmul.mubr.msk.bf16.vlgmr.msra.gmra.mxu1 %vm274_vm0, %v136_v27  ;;  %v3587_v42 = vld [vmem:[#allocation8 + $0xa4] ss:$16 sps:$4 sm:$0xff]   ;;  %v3588_v45 = vld [vmem:[#allocation8 + $0x2a0] ss:$16 sps:$4 sm:$0xff]  }
  0x67   :  { %373 = vmatpush1.bf16.msra.mxu0 %v3149_v28  ;;  %414 = vmatpush1.bf16.msra.mxu1 %v3151_v29  ;;  %v3590_v43 = vld [vmem:[#allocation8 + $0x2a4] ss:$16 sps:$4 sm:$0xff]   ;;  %v3591_v48 = vld [vmem:[#allocation8 + $0x80] ss:$16 sps:$4 sm:$0xff]  }
  0x68   :  { %374 = vmatprep.subr.bf16.mxu0 %v3142_v30  ;;  %415 = vmatprep.subr.bf16.mxu1 %v3144_v31  ;;  %v3593_v46 = vld [vmem:[#allocation8 + $0x84] ss:$16 sps:$4 sm:$0xff]   ;;  %v3594_v49 = vld [vmem:[#allocation8 + $0x280] ss:$16 sps:$4 sm:$0xff]  }
  0x69   :  { %392 = vmatprep.mubr.bf16.mxu0 %v4262_v0  ;;  %433 = vmatprep.mubr.bf16.mxu1 %v4262_v0  ;;  %v3596_v47 = vld [vmem:[#allocation8 + $0x284] ss:$16 sps:$4 sm:$0xff]   ;;  %v3597_v52 = vld [vmem:[#allocation8 + $0x60] ss:$16 sps:$4 sm:$0xff]  }
  0x6a   :  { %v3599_v50 = vld [vmem:[#allocation8 + $0x64] ss:$16 sps:$4 sm:$0xff]   ;;  %v3600_v53 = vld [vmem:[#allocation8 + $0x260] ss:$16 sps:$4 sm:$0xff]  }
  0x6b   :  { %375 = vmatpush1.bf16.msra.mxu0 %v3141_v32  ;;  %416 = vmatpush1.bf16.msra.mxu1 %v3143_v33  ;;  %v3602_v51 = vld [vmem:[#allocation8 + $0x264] ss:$16 sps:$4 sm:$0xff]   ;;  %v3603_v56 = vld [vmem:[#allocation8 + $0x40] ss:$16 sps:$4 sm:$0xff]  }
  0x6c   :  { %2015 = vmatprep.subr.bf16.mxu0 %v3575_v34  ;;  %2056 = vmatprep.subr.bf16.mxu1 %v3578_v35  ;;  %v3605_v54 = vld [vmem:[#allocation8 + $0x44] ss:$16 sps:$4 sm:$0xff]   ;;  %v3606_v57 = vld [vmem:[#allocation8 + $0x240] ss:$16 sps:$4 sm:$0xff]  }
  0x6d   :  { %v3608_v55 = vld [vmem:[#allocation8 + $0x244] ss:$16 sps:$4 sm:$0xff]   ;;  %v3609_v60 = vld [vmem:[#allocation8 + $0x20] ss:$16 sps:$4 sm:$0xff]  }
  0x6e   :  { %3155 = vmatmul.mubr.msk.bf16.vlgmr.msra.gmra.mxu0 %vm274_vm0, %v136_v27  ;;  %3156 = vmatmul.mubr.msk.bf16.vlgmr.msra.gmra.mxu1 %vm274_vm0, %v136_v27  ;;  %v3611_v58 = vld [vmem:[#allocation8 + $0x24] ss:$16 sps:$4 sm:$0xff]   ;;  %v3612_v61 = vld [vmem:[#allocation8 + $0x220] ss:$16 sps:$4 sm:$0xff]  }
  0x6f   :  { %2016 = vmatpush1.bf16.msra.mxu0 %v3573_v36  ;;  %2057 = vmatpush1.bf16.msra.mxu1 %v3576_v37  ;;  %v3614_v59 = vld [vmem:[#allocation8 + $0x224] ss:$16 sps:$4 sm:$0xff]   ;;  %v3615_v63 = vld [vmem:[#allocation8] ss:$16 sps:$4 sm:$0xff]   ;;  %v154_v36 = vlaneseq }
  0x70   :  { %2017 = vmatprep.subr.bf16.mxu0 %v3581_v38  ;;  %2058 = vmatprep.subr.bf16.mxu1 %v3584_v39  ;;  %v3617_v62 = vld [vmem:[#allocation8 + $0x4] ss:$16 sps:$4 sm:$0xff]   ;;  %v3618_v1 = vld [vmem:[#allocation8 + $0x200] ss:$16 sps:$4 sm:$0xff]   ;;  %v4362_v39 = vld [vmem:[#allocation7] sm:$0xff] }
  0x71   :  { %v3620_v0 = vld [vmem:[#allocation8 + $0x204] ss:$16 sps:$4 sm:$0xff]   ;;  %v3621_v4 = vld [vmem:[#allocation8 + $0x1e0] ss:$16 sps:$4 sm:$0xff]   ;;  %v4357_v37 = vshrl.u32 %v154_v36, 7 }
  0x72   :  { %v3623_v2 = vld [vmem:[#allocation8 + $0x1e4] ss:$16 sps:$4 sm:$0xff]   ;;  %v3624_v5 = vld [vmem:[#allocation8 + $0x3e0] ss:$16 sps:$4 sm:$0xff]  }
  0x73   :  { %2018 = vmatpush1.bf16.msra.mxu0 %v3579_v40  ;;  %2059 = vmatpush1.bf16.msra.mxu1 %v3582_v41  ;;  %v3626_v3 = vld [vmem:[#allocation8 + $0x3e4] ss:$16 sps:$4 sm:$0xff]   ;;  %v3627_v8 = vld [vmem:[#allocation8 + $0x1c0] ss:$16 sps:$4 sm:$0xff]   ;;  %v4360_v38 = vsub.s32 0, %v4357_v37  ;;  %v164_v40 = vsub.s32 2, %v4357_v37 }
  0x74   :  { %2019 = vmatprep.subr.bf16.mxu0 %v3587_v42  ;;  %2060 = vmatprep.subr.bf16.mxu1 %v3590_v43  ;;  %v3629_v6 = vld [vmem:[#allocation8 + $0x1c4] ss:$16 sps:$4 sm:$0xff]   ;;  %v3630_v9 = vld [vmem:[#allocation8 + $0x3c0] ss:$16 sps:$4 sm:$0xff]   ;;  %v4366_v41 = vsub.s32 1, %v4357_v37  ;;  %v168_v42 = vsub.s32 3, %v4357_v37 }
  0x75   :  { %v3632_v7 = vld [vmem:[#allocation8 + $0x3c4] ss:$16 sps:$4 sm:$0xff]   ;;  %v3633_v12 = vld [vmem:[#allocation8 + $0x1a0] ss:$16 sps:$4 sm:$0xff]   ;;  %v157_v43 = vrot.slane %v4362_v39, %v4360_v38 }
  0x76   :  { %v3635_v10 = vld [vmem:[#allocation8 + $0x1a4] ss:$16 sps:$4 sm:$0xff]   ;;  %v3636_v13 = vld [vmem:[#allocation8 + $0x3a0] ss:$16 sps:$4 sm:$0xff]  }
  0x77   :  { %2020 = vmatpush1.bf16.msra.mxu0 %v3585_v44  ;;  %2061 = vmatpush1.bf16.msra.mxu1 %v3588_v45  ;;  %v3638_v11 = vld [vmem:[#allocation8 + $0x3a4] ss:$16 sps:$4 sm:$0xff]   ;;  %v3639_v16 = vld [vmem:[#allocation8 + $0x180] ss:$16 sps:$4 sm:$0xff]   ;;  %v165_v44 = vrot.slane %v4362_v39, %v164_v40  ;;  %v161_v45 = vrot.slane %v4362_v39, %v4366_v41 }
  0x78   :  { %2021 = vmatprep.subr.bf16.mxu0 %v3593_v46  ;;  %2062 = vmatprep.subr.bf16.mxu1 %v3596_v47  ;;  %v3641_v14 = vld [vmem:[#allocation8 + $0x184] ss:$16 sps:$4 sm:$0xff]   ;;  %v3642_v17 = vld [vmem:[#allocation8 + $0x380] ss:$16 sps:$4 sm:$0xff]   ;;  %v169_v47 = vrot.slane %v4362_v39, %v168_v42 }
  0x79   :  { %v3644_v15 = vld [vmem:[#allocation8 + $0x384] ss:$16 sps:$4 sm:$0xff]   ;;  %v3645_v20 = vld [vmem:[#allocation8 + $0x160] ss:$16 sps:$4 sm:$0xff]  }
  0x7a   :  { %v3647_v18 = vld [vmem:[#allocation8 + $0x164] ss:$16 sps:$4 sm:$0xff]   ;;  %v3648_v21 = vld [vmem:[#allocation8 + $0x360] ss:$16 sps:$4 sm:$0xff]  }
  0x7b   :  { %2022 = vmatpush1.bf16.msra.mxu0 %v3591_v48  ;;  %2063 = vmatpush1.bf16.msra.mxu1 %v3594_v49  ;;  %v3650_v19 = vld [vmem:[#allocation8 + $0x364] ss:$16 sps:$4 sm:$0xff]   ;;  %v3651_v24 = vld [vmem:[#allocation8 + $0x140] ss:$16 sps:$4 sm:$0xff]  }
  0x7c   :  { %2023 = vmatprep.subr.bf16.mxu0 %v3599_v50  ;;  %2064 = vmatprep.subr.bf16.mxu1 %v3602_v51  ;;  %v3653_v22 = vld [vmem:[#allocation8 + $0x144] ss:$16 sps:$4 sm:$0xff]   ;;  %v3654_v25 = vld [vmem:[#allocation8 + $0x340] ss:$16 sps:$4 sm:$0xff]  }
  0x7d   :  { %v3656_v23 = vld [vmem:[#allocation8 + $0x344] ss:$16 sps:$4 sm:$0xff]   ;;  %v3657_v28 = vld [vmem:[#allocation8 + $0x120] ss:$16 sps:$4 sm:$0xff]  }
  0x7e   :  { %v3659_v26 = vld [vmem:[#allocation8 + $0x124] ss:$16 sps:$4 sm:$0xff]   ;;  %v3660_v29 = vld [vmem:[#allocation8 + $0x320] ss:$16 sps:$4 sm:$0xff]  }
  0x7f   :  { %2024 = vmatpush1.bf16.msra.mxu0 %v3597_v52  ;;  %2065 = vmatpush1.bf16.msra.mxu1 %v3600_v53  ;;  %v3662_v27 = vld [vmem:[#allocation8 + $0x324] ss:$16 sps:$4 sm:$0xff]   ;;  %v3663_v32 = vld [vmem:[#allocation8 + $0x100] ss:$16 sps:$4 sm:$0xff]  }
  0x80   :  { %2025 = vmatprep.subr.bf16.mxu0 %v3605_v54  ;;  %2066 = vmatprep.subr.bf16.mxu1 %v3608_v55  ;;  %v3665_v30 = vld [vmem:[#allocation8 + $0x104] ss:$16 sps:$4 sm:$0xff]   ;;  %v3666_v33 = vld [vmem:[#allocation8 + $0x300] ss:$16 sps:$4 sm:$0xff]   ;;  %v176_v54 = vsub.s32 5, %v4357_v37 }
  0x81   :  { %v3668_v31 = vld [vmem:[#allocation8 + $0x304] ss:$16 sps:$4 sm:$0xff]  }
  0x82   :  { %v3671_v34 = vld [vmem:[#allocation8 + $0x4e4] ss:$16 sps:$4 sm:$0xff]  }
  0x83   :  { %2026 = vmatpush1.bf16.msra.mxu0 %v3603_v56  ;;  %2067 = vmatpush1.bf16.msra.mxu1 %v3606_v57  ;;  %v3674_v35 = vld [vmem:[#allocation8 + $0x6e4] ss:$16 sps:$4 sm:$0xff]  }
  0x84   :  { %2027 = vmatprep.subr.bf16.mxu0 %v3611_v58  ;;  %2068 = vmatprep.subr.bf16.mxu1 %v3614_v59  ;;  %v184_v59 = vsub.s32 7, %v4357_v37  ;;  %v3698_v36 = vld [vmem:[#allocation8 + $0x664] ss:$16 sps:$4 sm:$0xff]  }
  0x87   :  { %2028 = vmatpush1.bf16.msra.mxu0 %v3609_v60  ;;  %2069 = vmatpush1.bf16.msra.mxu1 %v3612_v61 }
  0x88   :  { %2029 = vmatprep.subr.bf16.mxu0 %v3617_v62  ;;  %2070 = vmatprep.subr.bf16.mxu1 %v3620_v0 }
  0x8b   :  { %2030 = vmatpush1.bf16.msra.mxu0 %v3615_v63  ;;  %2071 = vmatpush1.bf16.msra.mxu1 %v3618_v1 }
  0x8c   :  { %2031 = vmatprep.subr.bf16.mxu0 %v3623_v2  ;;  %2072 = vmatprep.subr.bf16.mxu1 %v3626_v3  ;;  %v3669_v3 = vld [vmem:[#allocation8 + $0x4e0] ss:$16 sps:$4 sm:$0xff]  }
  0x8f   :  { %2032 = vmatpush2.bf16.msra.mxu0 %v3621_v4  ;;  %2073 = vmatpush2.bf16.msra.mxu1 %v3624_v5  ;;  %v177_v4 = vrot.slane %v4362_v39, %v176_v54  ;;  %v3716_v54 = vld [vmem:[#allocation8 + $0x604] ss:$16 sps:$4 sm:$0xff]  }
  0x90   :  { %2033 = vmatprep.subr.bf16.mxu0 %v3629_v6  ;;  %2074 = vmatprep.subr.bf16.mxu1 %v3632_v7  ;;  %v3672_v7 = vld [vmem:[#allocation8 + $0x6e0] ss:$16 sps:$4 sm:$0xff]  }
  0x93   :  { %2034 = vmatpush2.bf16.msra.mxu0 %v3627_v8  ;;  %2075 = vmatpush2.bf16.msra.mxu1 %v3630_v9  ;;  %v3677_v8 = vld [vmem:[#allocation8 + $0x4c4] ss:$16 sps:$4 sm:$0xff]  }
  0x94   :  { %2035 = vmatprep.subr.bf16.mxu0 %v3635_v10  ;;  %2076 = vmatprep.subr.bf16.mxu1 %v3638_v11  ;;  %v185_v10 = vrot.slane %v4362_v39, %v184_v59  ;;  %v3680_v11 = vld [vmem:[#allocation8 + $0x6c4] ss:$16 sps:$4 sm:$0xff]   ;;  %v3717_v59 = vld [vmem:[#allocation8 + $0x5e0] ss:$16 sps:$4 sm:$0xff]  }
  0x97   :  { %2036 = vmatpush2.bf16.msra.mxu0 %v3633_v12  ;;  %2077 = vmatpush2.bf16.msra.mxu1 %v3636_v13 }
  0x98   :  { %2037 = vmatprep.subr.bf16.mxu0 %v3641_v14  ;;  %2078 = vmatprep.subr.bf16.mxu1 %v3644_v15  ;;  %v3675_v14 = vld [vmem:[#allocation8 + $0x4c0] ss:$16 sps:$4 sm:$0xff]  }
  0x9b   :  { %2038 = vmatpush2.bf16.msra.mxu0 %v3639_v16  ;;  %2079 = vmatpush2.bf16.msra.mxu1 %v3642_v17  ;;  %v3678_v17 = vld [vmem:[#allocation8 + $0x6c0] ss:$16 sps:$4 sm:$0xff]  }
  0x9c   :  { %2039 = vmatprep.subr.bf16.mxu0 %v3647_v18  ;;  %2080 = vmatprep.subr.bf16.mxu1 %v3650_v19  ;;  %v3683_v18 = vld [vmem:[#allocation8 + $0x4a4] ss:$16 sps:$4 sm:$0xff]  }
  0x9f   :  { %2040 = vmatpush2.bf16.msra.mxu0 %v3645_v20  ;;  %2081 = vmatpush2.bf16.msra.mxu1 %v3648_v21  ;;  %v3686_v21 = vld [vmem:[#allocation8 + $0x6a4] ss:$16 sps:$4 sm:$0xff]  }
  0xa0   :  { %2041 = vmatprep.subr.bf16.mxu0 %v3653_v22  ;;  %2082 = vmatprep.subr.bf16.mxu1 %v3656_v23 }
  0xa3   :  { %2042 = vmatpush2.bf16.msra.mxu0 %v3651_v24  ;;  %2083 = vmatpush2.bf16.msra.mxu1 %v3654_v25 }
  0xa4   :  { %2043 = vmatprep.subr.bf16.mxu0 %v3659_v26  ;;  %2084 = vmatprep.subr.bf16.mxu1 %v3662_v27  ;;  %v3681_v26 = vld [vmem:[#allocation8 + $0x4a0] ss:$16 sps:$4 sm:$0xff]  }
  0xa7   :  { %2044 = vmatpush2.bf16.msra.mxu0 %v3657_v28  ;;  %2085 = vmatpush2.bf16.msra.mxu1 %v3660_v29  ;;  %v3684_v29 = vld [vmem:[#allocation8 + $0x6a0] ss:$16 sps:$4 sm:$0xff]  }
  0xa8   :  { %2045 = vmatprep.subr.bf16.mxu0 %v3665_v30  ;;  %2086 = vmatprep.subr.bf16.mxu1 %v3668_v31  ;;  %v3689_v30 = vld [vmem:[#allocation8 + $0x484] ss:$16 sps:$4 sm:$0xff]  }
  0xab   :  { %2046 = vmatpush2.bf16.msra.mxu0 %v3663_v32  ;;  %2087 = vmatpush2.bf16.msra.mxu1 %v3666_v33  ;;  %v3692_v32 = vld [vmem:[#allocation8 + $0x684] ss:$16 sps:$4 sm:$0xff]   ;;  %v3687_v33 = vld [vmem:[#allocation8 + $0x480] ss:$16 sps:$4 sm:$0xff]  }
  0xac   :  { %2097 = vmatprep.subr.bf16.mxu0 %v3671_v34  ;;  %2138 = vmatprep.subr.bf16.mxu1 %v3674_v35  ;;  %v3690_v34 = vld [vmem:[#allocation8 + $0x680] ss:$16 sps:$4 sm:$0xff]   ;;  %v3695_v35 = vld [vmem:[#allocation8 + $0x464] ss:$16 sps:$4 sm:$0xff]  }
 0x126   :  { %v312_v46 = vpop.f32.mrf.mxu0  ;;  %v353_v49 = vpop.f32.mrf.mxu1 }
 0x127   :  { %v313_v48 = vadd.f32 %v312_v46, %v157_v43  ;;  %v354_v50 = vadd.f32 %v353_v49, %v165_v44  ;;  %v3693_v43 = vld [vmem:[#allocation8 + $0x460] ss:$16 sps:$4 sm:$0xff]   ;;  %v3704_v46 = vld [vmem:[#allocation8 + $0x644] ss:$16 sps:$4 sm:$0xff]  }
 0x128   :  { %v314_v51 = vpop.f32.mrf.mxu0  ;;  %v355_v53 = vpop.f32.mrf.mxu1  ;;  %v3696_v44 = vld [vmem:[#allocation8 + $0x660] ss:$16 sps:$4 sm:$0xff]   ;;  %v3707_v49 = vld [vmem:[#allocation8 + $0x424] ss:$16 sps:$4 sm:$0xff]  }
 0x129   :  { %v315_v52 = vadd.f32 %v314_v51, %v161_v45  ;;  %v442_v55 = vmax.f32 %v313_v48, 0.0  ;;  %v444_v56 = vmax.f32 %v354_v50, 0.0  ;;  %v356_v57 = vadd.f32 %v355_v53, %v169_v47  ;;  %v3701_v45 = vld [vmem:[#allocation8 + $0x444] ss:$16 sps:$4 sm:$0xff]   ;;  %v3699_v47 = vld [vmem:[#allocation8 + $0x440] ss:$16 sps:$4 sm:$0xff]  }
 0x12a   :  { %v316_v58 = vpop.f32.mrf.mxu0  ;;  %v357_v61 = vpop.f32.mrf.mxu1  ;;  %v3702_v48 = vld [vmem:[#allocation8 + $0x640] ss:$16 sps:$4 sm:$0xff]   ;;  %v3710_v50 = vld [vmem:[#allocation8 + $0x624] ss:$16 sps:$4 sm:$0xff]  }
 0x12b   :  { %v443_v60 = vmax.f32 %v315_v52, 0.0  ;;  %v445_v62 = vmax.f32 %v356_v57, 0.0  ;;  %v4381_v0 = vpack.c.bf16 %v444_v56, %v444_v56  ;;  %v4386_v5 = vpack.c.bf16 %v442_v55, %v442_v55  ;;  %v3705_v51 = vld [vmem:[#allocation8 + $0x420] ss:$16 sps:$4 sm:$0xff]   ;;  %v3713_v53 = vld [vmem:[#allocation8 + $0x404] ss:$16 sps:$4 sm:$0xff]  }
 0x12c   :  { %v317_v63 = vpop.f32.mrf.mxu0  ;;  %v358_v2 = vpop.f32.mrf.mxu1  ;;  %v3708_v52 = vld [vmem:[#allocation8 + $0x620] ss:$16 sps:$4 sm:$0xff]   ;;  %v3719_v57 = vld [vmem:[#allocation8 + $0x5e4] ss:$16 sps:$4 sm:$0xff]  }
 0x12d   :  { %v4383_v1 = vpack.c.bf16 %v443_v60, %v443_v60  ;;  %v4388_v6 = vpack.c.bf16 %v445_v62, %v445_v62  ;;  %v3711_v55 = vld [vmem:[#allocation8 + $0x400] ss:$16 sps:$4 sm:$0xff]   ;;  %v3722_v58 = vld [vmem:[#allocation8 + $0x7e4] ss:$16 sps:$4 sm:$0xff]  }
 0x12e   :  { %v4390_v9 = vpop.f32.mrf.mxu0  ;;  %v4394_v12 = vpop.f32.mrf.mxu1  ;;  %v3714_v56 = vld [vmem:[#allocation8 + $0x600] ss:$16 sps:$4 sm:$0xff]   ;;  %v3725_v61 = vld [vmem:[#allocation8 + $0x5c4] ss:$16 sps:$4 sm:$0xff]  }
 0x12f   :  { %2047 = vmatprep.mubr.bf16.mxu0 %v4383_v1  ;;  %2088 = vmatprep.mubr.bf16.mxu1 %v4388_v6  ;;  %v3720_v60 = vld [vmem:[#allocation8 + $0x7e0] ss:$16 sps:$4 sm:$0xff]   ;;  %v3728_v62 = vld [vmem:[#allocation8 + $0x7c4] ss:$16 sps:$4 sm:$0xff]  }
 0x130   :  { %2048 = vmatmul.mubr.bf16.vlgmr.msra.gmra.mxu0 %v4386_v5  ;;  %v396_v13 = vpop.f32.mrf.mxu0  ;;  %2089 = vmatmul.mubr.bf16.vlgmr.msra.gmra.mxu1 %v4381_v0  ;;  %v437_v16 = vpop.f32.mrf.mxu1  ;;  %v3723_v63 = vld [vmem:[#allocation8 + $0x5c0] ss:$16 sps:$4 sm:$0xff]  }
 0x131   :  { %2098 = vmatpush1.bf16.msra.mxu0 %v3669_v3  ;;  %v397_v15 = vadd.f32 %v396_v13, %v177_v4  ;;  %2139 = vmatpush1.bf16.msra.mxu1 %v3672_v7  ;;  %v438_v20 = vadd.f32 %v437_v16, %v185_v10  ;;  %v3726_v2 = vld [vmem:[#allocation8 + $0x7c0] ss:$16 sps:$4 sm:$0xff]   ;;  %v3731_v3 = vld [vmem:[#allocation8 + $0x5a4] ss:$16 sps:$4 sm:$0xff]  }
 0x132   :  { %2099 = vmatprep.subr.bf16.mxu0 %v3677_v8  ;;  %v398_v19 = vpop.f32.mrf.mxu0  ;;  %2140 = vmatprep.subr.bf16.mxu1 %v3680_v11  ;;  %v439_v23 = vpop.f32.mrf.mxu1  ;;  %v3734_v4 = vld [vmem:[#allocation8 + $0x7a4] ss:$16 sps:$4 sm:$0xff]   ;;  %v3729_v7 = vld [vmem:[#allocation8 + $0x5a0] ss:$16 sps:$4 sm:$0xff]  }
 0x133   :  { %v447_v22 = vmax.f32 %v397_v15, 0.0  ;;  %v449_v24 = vmax.f32 %v438_v20, 0.0  ;;  %v3732_v8 = vld [vmem:[#allocation8 + $0x7a0] ss:$16 sps:$4 sm:$0xff]   ;;  %v3737_v10 = vld [vmem:[#allocation8 + $0x584] ss:$16 sps:$4 sm:$0xff]  }
 0x134   :  { %v399_v25 = vpop.f32.mrf.mxu0  ;;  %v440_v28 = vpop.f32.mrf.mxu1  ;;  %v3740_v11 = vld [vmem:[#allocation8 + $0x784] ss:$16 sps:$4 sm:$0xff]   ;;  %v3735_v13 = vld [vmem:[#allocation8 + $0x580] ss:$16 sps:$4 sm:$0xff]   ;;  %v172_v20 = vsub.s32 4, %v4357_v37 }
 0x135   :  { %2100 = vmatpush1.bf16.msra.mxu0 %v3675_v14  ;;  %v4399_v27 = vpack.c.bf16 %v447_v22, %v447_v22  ;;  %2141 = vmatpush1.bf16.msra.mxu1 %v3678_v17  ;;  %v4401_v31 = vpack.c.bf16 %v449_v24, %v449_v24  ;;  %v3738_v14 = vld [vmem:[#allocation8 + $0x780] ss:$16 sps:$4 sm:$0xff]   ;;  %v3743_v15 = vld [vmem:[#allocation8 + $0x564] ss:$16 sps:$4 sm:$0xff]  }
 0x136   :  { %2101 = vmatprep.subr.bf16.mxu0 %v3683_v18  ;;  %2142 = vmatprep.subr.bf16.mxu1 %v3686_v21  ;;  %v3746_v16 = vld [vmem:[#allocation8 + $0x764] ss:$16 sps:$4 sm:$0xff]   ;;  %v3741_v17 = vld [vmem:[#allocation8 + $0x560] ss:$16 sps:$4 sm:$0xff]   ;;  %v180_v18 = vsub.s32 6, %v4357_v37  ;;  %v173_v25 = vrot.slane %v4362_v39, %v172_v20 }
 0x137   :  { %2129 = vmatprep.mubr.bf16.mxu0 %v4399_v27  ;;  %2170 = vmatprep.mubr.bf16.mxu1 %v4401_v31  ;;  %v3744_v19 = vld [vmem:[#allocation8 + $0x760] ss:$16 sps:$4 sm:$0xff]   ;;  %v3749_v21 = vld [vmem:[#allocation8 + $0x544] ss:$16 sps:$4 sm:$0xff]   ;;  %v3813_v20 = vld [vmem:[#allocation8 + $0x1e8] ss:$16 sps:$4 sm:$0xff]  }
 0x138   :  { %v3752_v22 = vld [vmem:[#allocation8 + $0x744] ss:$16 sps:$4 sm:$0xff]   ;;  %v181_v23 = vrot.slane %v4362_v39, %v180_v18  ;;  %v3747_v24 = vld [vmem:[#allocation8 + $0x540] ss:$16 sps:$4 sm:$0xff]   ;;  %v3815_v18 = vld [vmem:[#allocation8 + $0x1ec] ss:$16 sps:$4 sm:$0xff]  }
 0x139   :  { %2102 = vmatpush1.bf16.msra.mxu0 %v3681_v26  ;;  %2143 = vmatpush1.bf16.msra.mxu1 %v3684_v29  ;;  %v3750_v26 = vld [vmem:[#allocation8 + $0x740] ss:$16 sps:$4 sm:$0xff]   ;;  %v3755_v28 = vld [vmem:[#allocation8 + $0x524] ss:$16 sps:$4 sm:$0xff]  }
 0x13a   :  { %2103 = vmatprep.subr.bf16.mxu0 %v3689_v30  ;;  %2144 = vmatprep.subr.bf16.mxu1 %v3692_v32  ;;  %v3758_v29 = vld [vmem:[#allocation8 + $0x724] ss:$16 sps:$4 sm:$0xff]   ;;  %v436_v30 = vadd.f32 %v4394_v12, %v181_v23  ;;  %v3753_v32 = vld [vmem:[#allocation8 + $0x520] ss:$16 sps:$4 sm:$0xff]   ;;  %v3770_v12 = vld [vmem:[#allocation8 + $0x2ec] ss:$16 sps:$4 sm:$0xff]  }
 0x13b   :  { %v3759_v39 = vld [vmem:[#allocation8 + $0x500] ss:$16 sps:$4 sm:$0xff]   ;;  %v3824_v23 = vld [vmem:[#allocation8 + $0x3cc] ss:$16 sps:$4 sm:$0xff]  }
 0x13d   :  { %2104 = vmatpush1.bf16.msra.mxu0 %v3687_v33  ;;  %2145 = vmatpush1.bf16.msra.mxu1 %v3690_v34  ;;  %v395_v33 = vadd.f32 %v4390_v9, %v173_v25  ;;  %v3756_v34 = vld [vmem:[#allocation8 + $0x720] ss:$16 sps:$4 sm:$0xff]   ;;  %v3765_v9 = vld [vmem:[#allocation8 + $0xe8] ss:$16 sps:$4 sm:$0xff]  }
 0x13e   :  { %2105 = vmatprep.subr.bf16.mxu0 %v3695_v35  ;;  %2146 = vmatprep.subr.bf16.mxu1 %v3698_v36  ;;  %v3761_v35 = vld [vmem:[#allocation8 + $0x504] ss:$16 sps:$4 sm:$0xff]   ;;  %v3822_v25 = vld [vmem:[#allocation8 + $0x3c8] ss:$16 sps:$4 sm:$0xff]  }
 0x13f   :  { %v3764_v36 = vld [vmem:[#allocation8 + $0x704] ss:$16 sps:$4 sm:$0xff]  }
 0x141   :  { %2106 = vmatpush1.bf16.msra.mxu0 %v3693_v43  ;;  %2147 = vmatpush1.bf16.msra.mxu1 %v3696_v44  ;;  %v448_v43 = vmax.f32 %v436_v30, 0.0  ;;  %v446_v44 = vmax.f32 %v395_v33, 0.0  ;;  %v3828_v30 = vld [vmem:[#allocation8 + $0x3a8] ss:$16 sps:$4 sm:$0xff]   ;;  %v3836_v33 = vld [vmem:[#allocation8 + $0x38c] ss:$16 sps:$4 sm:$0xff]  }
 0x142   :  { %2107 = vmatprep.subr.bf16.mxu0 %v3701_v45  ;;  %2148 = vmatprep.subr.bf16.mxu1 %v3704_v46  ;;  %v3762_v45 = vld [vmem:[#allocation8 + $0x700] ss:$16 sps:$4 sm:$0xff]   ;;  %v3767_v46 = vld [vmem:[#allocation8 + $0xec] ss:$16 sps:$4 sm:$0xff]  }
 0x145   :  { %2108 = vmatpush1.bf16.msra.mxu0 %v3699_v47  ;;  %2149 = vmatpush1.bf16.msra.mxu1 %v3702_v48  ;;  %v4411_v47 = vpack.c.bf16 %v448_v43, %v448_v43  ;;  %v4413_v48 = vpack.c.bf16 %v446_v44, %v446_v44  ;;  %v3842_v43 = vld [vmem:[#allocation8 + $0x36c] ss:$16 sps:$4 sm:$0xff]   ;;  %v3840_v44 = vld [vmem:[#allocation8 + $0x368] ss:$16 sps:$4 sm:$0xff]  }
 0x146   :  { %2109 = vmatprep.subr.bf16.mxu0 %v3707_v49  ;;  %2150 = vmatprep.subr.bf16.mxu1 %v3710_v50  ;;  %v3768_v49 = vld [vmem:[#allocation8 + $0x2e8] ss:$16 sps:$4 sm:$0xff]   ;;  %v3773_v50 = vld [vmem:[#allocation8 + $0xcc] ss:$16 sps:$4 sm:$0xff]  }
 0x149   :  { %2110 = vmatpush1.bf16.msra.mxu0 %v3705_v51  ;;  %2151 = vmatpush1.bf16.msra.mxu1 %v3708_v52  ;;  %v3776_v51 = vld [vmem:[#allocation8 + $0x2cc] ss:$16 sps:$4 sm:$0xff]   ;;  %v3771_v52 = vld [vmem:[#allocation8 + $0xc8] ss:$16 sps:$4 sm:$0xff]  }
 0x14a   :  { %2111 = vmatprep.subr.bf16.mxu0 %v3713_v53  ;;  %2152 = vmatprep.subr.bf16.mxu1 %v3716_v54  ;;  %v3774_v53 = vld [vmem:[#allocation8 + $0x2c8] ss:$16 sps:$4 sm:$0xff]   ;;  %v3779_v54 = vld [vmem:[#allocation8 + $0xac] ss:$16 sps:$4 sm:$0xff]  }
 0x14d   :  { %2112 = vmatpush1.bf16.msra.mxu0 %v3711_v55  ;;  %2153 = vmatpush1.bf16.msra.mxu1 %v3714_v56  ;;  %v3782_v55 = vld [vmem:[#allocation8 + $0x2ac] ss:$16 sps:$4 sm:$0xff]   ;;  %v3777_v56 = vld [vmem:[#allocation8 + $0xa8] ss:$16 sps:$4 sm:$0xff]  }
 0x14e   :  { %2113 = vmatprep.subr.bf16.mxu0 %v3719_v57  ;;  %2154 = vmatprep.subr.bf16.mxu1 %v3722_v58  ;;  %v3780_v57 = vld [vmem:[#allocation8 + $0x2a8] ss:$16 sps:$4 sm:$0xff]   ;;  %v3785_v58 = vld [vmem:[#allocation8 + $0x8c] ss:$16 sps:$4 sm:$0xff]  }
 0x151   :  { %2114 = vmatpush2.bf16.msra.mxu0 %v3717_v59  ;;  %2155 = vmatpush2.bf16.msra.mxu1 %v3720_v60  ;;  %v3788_v59 = vld [vmem:[#allocation8 + $0x28c] ss:$16 sps:$4 sm:$0xff]   ;;  %v3783_v60 = vld [vmem:[#allocation8 + $0x88] ss:$16 sps:$4 sm:$0xff]  }
 0x152   :  { %2115 = vmatprep.subr.bf16.mxu0 %v3725_v61  ;;  %2156 = vmatprep.subr.bf16.mxu1 %v3728_v62  ;;  %v3791_v61 = vld [vmem:[#allocation8 + $0x6c] ss:$16 sps:$4 sm:$0xff]  }
 0x153   :  { %v3794_v62 = vld [vmem:[#allocation8 + $0x26c] ss:$16 sps:$4 sm:$0xff]  }
 0x155   :  { %2116 = vmatpush2.bf16.msra.mxu0 %v3723_v63  ;;  %2157 = vmatpush2.bf16.msra.mxu1 %v3726_v2  ;;  %v3792_v63 = vld [vmem:[#allocation8 + $0x268] ss:$16 sps:$4 sm:$0xff]   ;;  %v3797_v2 = vld [vmem:[#allocation8 + $0x4c] ss:$16 sps:$4 sm:$0xff]  }
 0x156   :  { %2117 = vmatprep.subr.bf16.mxu0 %v3731_v3  ;;  %2158 = vmatprep.subr.bf16.mxu1 %v3734_v4  ;;  %v3800_v3 = vld [vmem:[#allocation8 + $0x24c] ss:$16 sps:$4 sm:$0xff]   ;;  %v3795_v4 = vld [vmem:[#allocation8 + $0x48] ss:$16 sps:$4 sm:$0xff]  }
 0x159   :  { %2118 = vmatpush2.bf16.msra.mxu0 %v3729_v7  ;;  %2159 = vmatpush2.bf16.msra.mxu1 %v3732_v8  ;;  %v3798_v7 = vld [vmem:[#allocation8 + $0x248] ss:$16 sps:$4 sm:$0xff]   ;;  %v3803_v8 = vld [vmem:[#allocation8 + $0x2c] ss:$16 sps:$4 sm:$0xff]  }
 0x15a   :  { %2119 = vmatprep.subr.bf16.mxu0 %v3737_v10  ;;  %2160 = vmatprep.subr.bf16.mxu1 %v3740_v11  ;;  %v3806_v10 = vld [vmem:[#allocation8 + $0x22c] ss:$16 sps:$4 sm:$0xff]   ;;  %v3801_v11 = vld [vmem:[#allocation8 + $0x28] ss:$16 sps:$4 sm:$0xff]  }
 0x15d   :  { %2120 = vmatpush2.bf16.msra.mxu0 %v3735_v13  ;;  %2161 = vmatpush2.bf16.msra.mxu1 %v3738_v14  ;;  %v3804_v13 = vld [vmem:[#allocation8 + $0x228] ss:$16 sps:$4 sm:$0xff]   ;;  %v3809_v14 = vld [vmem:[#allocation8 + $0xc] ss:$16 sps:$4 sm:$0xff]  }
 0x15e   :  { %2121 = vmatprep.subr.bf16.mxu0 %v3743_v15  ;;  %2162 = vmatprep.subr.bf16.mxu1 %v3746_v16  ;;  %v3812_v15 = vld [vmem:[#allocation8 + $0x20c] ss:$16 sps:$4 sm:$0xff]   ;;  %v3807_v16 = vld [vmem:[#allocation8 + $0x8] ss:$16 sps:$4 sm:$0xff]  }
 0x161   :  { %2122 = vmatpush2.bf16.msra.mxu0 %v3741_v17  ;;  %2163 = vmatpush2.bf16.msra.mxu1 %v3744_v19  ;;  %v3810_v17 = vld [vmem:[#allocation8 + $0x208] ss:$16 sps:$4 sm:$0xff]   ;;  %v3818_v19 = vld [vmem:[#allocation8 + $0x3ec] ss:$16 sps:$4 sm:$0xff]  }
 0x162   :  { %2123 = vmatprep.subr.bf16.mxu0 %v3749_v21  ;;  %2164 = vmatprep.subr.bf16.mxu1 %v3752_v22  ;;  %v3816_v21 = vld [vmem:[#allocation8 + $0x3e8] ss:$16 sps:$4 sm:$0xff]   ;;  %v3821_v22 = vld [vmem:[#allocation8 + $0x1cc] ss:$16 sps:$4 sm:$0xff]  }
 0x165   :  { %2124 = vmatpush2.bf16.msra.mxu0 %v3747_v24  ;;  %2165 = vmatpush2.bf16.msra.mxu1 %v3750_v26  ;;  %v3819_v24 = vld [vmem:[#allocation8 + $0x1c8] ss:$16 sps:$4 sm:$0xff]   ;;  %v3827_v26 = vld [vmem:[#allocation8 + $0x1ac] ss:$16 sps:$4 sm:$0xff]  }
 0x166   :  { %2125 = vmatprep.subr.bf16.mxu0 %v3755_v28  ;;  %2166 = vmatprep.subr.bf16.mxu1 %v3758_v29  ;;  %v3830_v28 = vld [vmem:[#allocation8 + $0x3ac] ss:$16 sps:$4 sm:$0xff]   ;;  %v3825_v29 = vld [vmem:[#allocation8 + $0x1a8] ss:$16 sps:$4 sm:$0xff]  }
 0x169   :  { %2126 = vmatpush2.bf16.msra.mxu0 %v3753_v32  ;;  %2167 = vmatpush2.bf16.msra.mxu1 %v3756_v34  ;;  %v3833_v32 = vld [vmem:[#allocation8 + $0x18c] ss:$16 sps:$4 sm:$0xff]   ;;  %v3831_v34 = vld [vmem:[#allocation8 + $0x188] ss:$16 sps:$4 sm:$0xff]  }
 0x16a   :  { %2127 = vmatprep.subr.bf16.mxu0 %v3761_v35  ;;  %2168 = vmatprep.subr.bf16.mxu1 %v3764_v36  ;;  %v3834_v35 = vld [vmem:[#allocation8 + $0x388] ss:$16 sps:$4 sm:$0xff]   ;;  %v3839_v36 = vld [vmem:[#allocation8 + $0x16c] ss:$16 sps:$4 sm:$0xff]  }
 0x16d   :  { %2128 = vmatpush2.bf16.msra.mxu0 %v3759_v39  ;;  %2169 = vmatpush2.bf16.msra.mxu1 %v3762_v45  ;;  %v3837_v39 = vld [vmem:[#allocation8 + $0x168] ss:$16 sps:$4 sm:$0xff]   ;;  %v3845_v45 = vld [vmem:[#allocation8 + $0x14c] ss:$16 sps:$4 sm:$0xff]  }
 0x16e   :  { %2179 = vmatprep.subr.bf16.mxu0 %v3767_v46  ;;  %2220 = vmatprep.subr.bf16.mxu1 %v3770_v12  ;;  %v3848_v46 = vld [vmem:[#allocation8 + $0x34c] ss:$16 sps:$4 sm:$0xff]   ;;  %v3843_v12 = vld [vmem:[#allocation8 + $0x148] ss:$16 sps:$4 sm:$0xff]  }
 0x170   :  { %2130 = vmatmul.mubr.bf16.vlgmr.msra.gmra.mxu0 %v4413_v48  ;;  %2171 = vmatmul.mubr.bf16.vlgmr.msra.gmra.mxu1 %v4411_v47 }
 0x171   :  { %2180 = vmatpush1.bf16.msra.mxu0 %v3765_v9  ;;  %2211 = vmatprep.mubr.bf16.mxu0 %v4383_v1  ;;  %v3786_v1 = vld [vmem:[#allocation8 + $0x288] ss:$16 sps:$4 sm:$0xff]  }
 0x172   :  { %2221 = vmatpush1.bf16.msra.mxu1 %v3768_v49  ;;  %2252 = vmatprep.mubr.bf16.mxu1 %v4388_v6  ;;  %v3789_v6 = vld [vmem:[#allocation8 + $0x68] ss:$16 sps:$4 sm:$0xff]   ;;  %v3851_v49 = vld [vmem:[#allocation8 + $0x12c] ss:$16 sps:$4 sm:$0xff]  }
 0x173   :  { %2181 = vmatprep.subr.bf16.mxu0 %v3773_v50  ;;  %2222 = vmatprep.subr.bf16.mxu1 %v3776_v51  ;;  %v3846_v9 = vld [vmem:[#allocation8 + $0x348] ss:$16 sps:$4 sm:$0xff]   ;;  %v3854_v50 = vld [vmem:[#allocation8 + $0x32c] ss:$16 sps:$4 sm:$0xff]  }
 0x174   :  { %v3849_v51 = vld [vmem:[#allocation8 + $0x128] ss:$16 sps:$4 sm:$0xff]  }
 0x175   :  { %2182 = vmatpush1.bf16.msra.mxu0 %v3771_v52  ;;  %v3852_v52 = vld [vmem:[#allocation8 + $0x328] ss:$16 sps:$4 sm:$0xff]  }
 0x176   :  { %2223 = vmatpush1.bf16.msra.mxu1 %v3774_v53  ;;  %2183 = vmatprep.subr.bf16.mxu0 %v3779_v54  ;;  %v3857_v53 = vld [vmem:[#allocation8 + $0x10c] ss:$16 sps:$4 sm:$0xff]  }
 0x177   :  { %2224 = vmatprep.subr.bf16.mxu1 %v3782_v55  ;;  %v3860_v54 = vld [vmem:[#allocation8 + $0x30c] ss:$16 sps:$4 sm:$0xff]   ;;  %v3855_v55 = vld [vmem:[#allocation8 + $0x108] ss:$16 sps:$4 sm:$0xff]  }
 0x179   :  { %2184 = vmatpush1.bf16.msra.mxu0 %v3777_v56  ;;  %v3858_v56 = vld [vmem:[#allocation8 + $0x308] ss:$16 sps:$4 sm:$0xff]  }
 0x17a   :  { %2225 = vmatpush1.bf16.msra.mxu1 %v3780_v57  ;;  %2185 = vmatprep.subr.bf16.mxu0 %v3785_v58  ;;  %v3863_v57 = vld [vmem:[#allocation8 + $0x4ec] ss:$16 sps:$4 sm:$0xff]  }
 0x17b   :  { %2226 = vmatprep.subr.bf16.mxu1 %v3788_v59  ;;  %v3866_v58 = vld [vmem:[#allocation8 + $0x6ec] ss:$16 sps:$4 sm:$0xff]   ;;  %v3861_v59 = vld [vmem:[#allocation8 + $0x4e8] ss:$16 sps:$4 sm:$0xff]  }
 0x17d   :  { %2186 = vmatpush1.bf16.msra.mxu0 %v3783_v60  ;;  %v3864_v60 = vld [vmem:[#allocation8 + $0x6e8] ss:$16 sps:$4 sm:$0xff]  }
 0x17e   :  { %2227 = vmatpush1.bf16.msra.mxu1 %v3786_v1  ;;  %2187 = vmatprep.subr.bf16.mxu0 %v3791_v61  ;;  %v3869_v1 = vld [vmem:[#allocation8 + $0x4cc] ss:$16 sps:$4 sm:$0xff]  }
 0x17f   :  { %2228 = vmatprep.subr.bf16.mxu1 %v3794_v62  ;;  %v3872_v61 = vld [vmem:[#allocation8 + $0x6cc] ss:$16 sps:$4 sm:$0xff]   ;;  %v3867_v62 = vld [vmem:[#allocation8 + $0x4c8] ss:$16 sps:$4 sm:$0xff]  }
 0x181   :  { %2188 = vmatpush1.bf16.msra.mxu0 %v3789_v6  ;;  %v3870_v6 = vld [vmem:[#allocation8 + $0x6c8] ss:$16 sps:$4 sm:$0xff]  }
 0x182   :  { %2229 = vmatpush1.bf16.msra.mxu1 %v3792_v63  ;;  %2189 = vmatprep.subr.bf16.mxu0 %v3797_v2  ;;  %v3875_v63 = vld [vmem:[#allocation8 + $0x4ac] ss:$16 sps:$4 sm:$0xff]  }
 0x183   :  { %2230 = vmatprep.subr.bf16.mxu1 %v3800_v3  ;;  %v3878_v2 = vld [vmem:[#allocation8 + $0x6ac] ss:$16 sps:$4 sm:$0xff]   ;;  %v3873_v3 = vld [vmem:[#allocation8 + $0x4a8] ss:$16 sps:$4 sm:$0xff]  }
 0x185   :  { %2190 = vmatpush1.bf16.msra.mxu0 %v3795_v4  ;;  %v3881_v4 = vld [vmem:[#allocation8 + $0x48c] ss:$16 sps:$4 sm:$0xff]  }
 0x186   :  { %2231 = vmatpush1.bf16.msra.mxu1 %v3798_v7  ;;  %2191 = vmatprep.subr.bf16.mxu0 %v3803_v8  ;;  %v3879_v7 = vld [vmem:[#allocation8 + $0x488] ss:$16 sps:$4 sm:$0xff]   ;;  %v3887_v8 = vld [vmem:[#allocation8 + $0x46c] ss:$16 sps:$4 sm:$0xff]  }
 0x187   :  { %2232 = vmatprep.subr.bf16.mxu1 %v3806_v10  ;;  %v3890_v10 = vld [vmem:[#allocation8 + $0x66c] ss:$16 sps:$4 sm:$0xff]  }
 0x189   :  { %2192 = vmatpush1.bf16.msra.mxu0 %v3801_v11  ;;  %v3888_v11 = vld [vmem:[#allocation8 + $0x668] ss:$16 sps:$4 sm:$0xff]  }
 0x18a   :  { %2233 = vmatpush1.bf16.msra.mxu1 %v3804_v13  ;;  %2193 = vmatprep.subr.bf16.mxu0 %v3809_v14  ;;  %v3893_v13 = vld [vmem:[#allocation8 + $0x44c] ss:$16 sps:$4 sm:$0xff]  }
 0x18b   :  { %2234 = vmatprep.subr.bf16.mxu1 %v3812_v15  ;;  %v3896_v14 = vld [vmem:[#allocation8 + $0x64c] ss:$16 sps:$4 sm:$0xff]   ;;  %v3891_v15 = vld [vmem:[#allocation8 + $0x448] ss:$16 sps:$4 sm:$0xff]  }
 0x18d   :  { %2194 = vmatpush1.bf16.msra.mxu0 %v3807_v16  ;;  %v3894_v16 = vld [vmem:[#allocation8 + $0x648] ss:$16 sps:$4 sm:$0xff]  }
 0x18e   :  { %2235 = vmatpush1.bf16.msra.mxu1 %v3810_v17  ;;  %2195 = vmatprep.subr.bf16.mxu0 %v3815_v18  ;;  %v3899_v17 = vld [vmem:[#allocation8 + $0x42c] ss:$16 sps:$4 sm:$0xff]  }
 0x18f   :  { %2236 = vmatprep.subr.bf16.mxu1 %v3818_v19  ;;  %v3902_v18 = vld [vmem:[#allocation8 + $0x62c] ss:$16 sps:$4 sm:$0xff]   ;;  %v3897_v19 = vld [vmem:[#allocation8 + $0x428] ss:$16 sps:$4 sm:$0xff]  }
 0x191   :  { %2196 = vmatpush2.bf16.msra.mxu0 %v3813_v20  ;;  %v3900_v20 = vld [vmem:[#allocation8 + $0x628] ss:$16 sps:$4 sm:$0xff]  }
 0x192   :  { %2237 = vmatpush2.bf16.msra.mxu1 %v3816_v21  ;;  %2197 = vmatprep.subr.bf16.mxu0 %v3821_v22  ;;  %v3905_v21 = vld [vmem:[#allocation8 + $0x40c] ss:$16 sps:$4 sm:$0xff]  }
 0x193   :  { %2238 = vmatprep.subr.bf16.mxu1 %v3824_v23  ;;  %v3908_v22 = vld [vmem:[#allocation8 + $0x60c] ss:$16 sps:$4 sm:$0xff]   ;;  %v3903_v23 = vld [vmem:[#allocation8 + $0x408] ss:$16 sps:$4 sm:$0xff]  }
 0x195   :  { %2198 = vmatpush2.bf16.msra.mxu0 %v3819_v24  ;;  %v3906_v24 = vld [vmem:[#allocation8 + $0x608] ss:$16 sps:$4 sm:$0xff]  }
 0x196   :  { %2239 = vmatpush2.bf16.msra.mxu1 %v3822_v25  ;;  %2199 = vmatprep.subr.bf16.mxu0 %v3827_v26  ;;  %v3911_v25 = vld [vmem:[#allocation8 + $0x5ec] ss:$16 sps:$4 sm:$0xff]  }
 0x197   :  { %2240 = vmatprep.subr.bf16.mxu1 %v3830_v28  ;;  %v3914_v26 = vld [vmem:[#allocation8 + $0x7ec] ss:$16 sps:$4 sm:$0xff]   ;;  %v3909_v28 = vld [vmem:[#allocation8 + $0x5e8] ss:$16 sps:$4 sm:$0xff]  }
 0x199   :  { %2200 = vmatpush2.bf16.msra.mxu0 %v3825_v29  ;;  %v3912_v29 = vld [vmem:[#allocation8 + $0x7e8] ss:$16 sps:$4 sm:$0xff]  }
 0x19a   :  { %2241 = vmatpush2.bf16.msra.mxu1 %v3828_v30  ;;  %2201 = vmatprep.subr.bf16.mxu0 %v3833_v32  ;;  %v3917_v30 = vld [vmem:[#allocation8 + $0x5cc] ss:$16 sps:$4 sm:$0xff]  }
 0x19b   :  { %2242 = vmatprep.subr.bf16.mxu1 %v3836_v33  ;;  %v3920_v32 = vld [vmem:[#allocation8 + $0x7cc] ss:$16 sps:$4 sm:$0xff]   ;;  %v3915_v33 = vld [vmem:[#allocation8 + $0x5c8] ss:$16 sps:$4 sm:$0xff]  }
 0x19d   :  { %2202 = vmatpush2.bf16.msra.mxu0 %v3831_v34  ;;  %v3918_v34 = vld [vmem:[#allocation8 + $0x7c8] ss:$16 sps:$4 sm:$0xff]  }
 0x19e   :  { %2243 = vmatpush2.bf16.msra.mxu1 %v3834_v35  ;;  %2203 = vmatprep.subr.bf16.mxu0 %v3839_v36  ;;  %v3923_v35 = vld [vmem:[#allocation8 + $0x5ac] ss:$16 sps:$4 sm:$0xff]  }
 0x19f   :  { %2244 = vmatprep.subr.bf16.mxu1 %v3842_v43  ;;  %v3926_v36 = vld [vmem:[#allocation8 + $0x7ac] ss:$16 sps:$4 sm:$0xff]   ;;  %v3921_v43 = vld [vmem:[#allocation8 + $0x5a8] ss:$16 sps:$4 sm:$0xff]  }
 0x1a1   :  { %2204 = vmatpush2.bf16.msra.mxu0 %v3837_v39  ;;  %v3924_v39 = vld [vmem:[#allocation8 + $0x7a8] ss:$16 sps:$4 sm:$0xff]  }
 0x1a2   :  { %2245 = vmatpush2.bf16.msra.mxu1 %v3840_v44  ;;  %2205 = vmatprep.subr.bf16.mxu0 %v3845_v45  ;;  %v3929_v44 = vld [vmem:[#allocation8 + $0x58c] ss:$16 sps:$4 sm:$0xff]  }
 0x1a3   :  { %2246 = vmatprep.subr.bf16.mxu1 %v3848_v46  ;;  %v3932_v45 = vld [vmem:[#allocation8 + $0x78c] ss:$16 sps:$4 sm:$0xff]   ;;  %v3927_v46 = vld [vmem:[#allocation8 + $0x588] ss:$16 sps:$4 sm:$0xff]  }
 0x1a5   :  { %2206 = vmatpush2.bf16.msra.mxu0 %v3843_v12  ;;  %v3930_v12 = vld [vmem:[#allocation8 + $0x788] ss:$16 sps:$4 sm:$0xff]  }
 0x1a6   :  { %2247 = vmatpush2.bf16.msra.mxu1 %v3846_v9  ;;  %2207 = vmatprep.subr.bf16.mxu0 %v3851_v49  ;;  %v3935_v9 = vld [vmem:[#allocation8 + $0x56c] ss:$16 sps:$4 sm:$0xff]  }
 0x1a7   :  { %2248 = vmatprep.subr.bf16.mxu1 %v3854_v50  ;;  %v3938_v49 = vld [vmem:[#allocation8 + $0x76c] ss:$16 sps:$4 sm:$0xff]   ;;  %v3933_v50 = vld [vmem:[#allocation8 + $0x568] ss:$16 sps:$4 sm:$0xff]  }
 0x1a9   :  { %2208 = vmatpush2.bf16.msra.mxu0 %v3849_v51  ;;  %v3936_v51 = vld [vmem:[#allocation8 + $0x768] ss:$16 sps:$4 sm:$0xff]  }
 0x1aa   :  { %2249 = vmatpush2.bf16.msra.mxu1 %v3852_v52  ;;  %2209 = vmatprep.subr.bf16.mxu0 %v3857_v53  ;;  %v3941_v52 = vld [vmem:[#allocation8 + $0x54c] ss:$16 sps:$4 sm:$0xff]  }
 0x1ab   :  { %2250 = vmatprep.subr.bf16.mxu1 %v3860_v54  ;;  %v3944_v53 = vld [vmem:[#allocation8 + $0x74c] ss:$16 sps:$4 sm:$0xff]   ;;  %v3939_v54 = vld [vmem:[#allocation8 + $0x548] ss:$16 sps:$4 sm:$0xff]  }
 0x1ad   :  { %2210 = vmatpush2.bf16.msra.mxu0 %v3855_v55  ;;  %v3942_v55 = vld [vmem:[#allocation8 + $0x748] ss:$16 sps:$4 sm:$0xff]  }
 0x1ae   :  { %2251 = vmatpush2.bf16.msra.mxu1 %v3858_v56  ;;  %2261 = vmatprep.subr.bf16.mxu0 %v3863_v57  ;;  %v3947_v56 = vld [vmem:[#allocation8 + $0x52c] ss:$16 sps:$4 sm:$0xff]  }
 0x1af   :  { %2302 = vmatprep.subr.bf16.mxu1 %v3866_v58  ;;  %v3950_v57 = vld [vmem:[#allocation8 + $0x72c] ss:$16 sps:$4 sm:$0xff]   ;;  %v3945_v58 = vld [vmem:[#allocation8 + $0x528] ss:$16 sps:$4 sm:$0xff]  }
 0x1b0   :  { %2212 = vmatmul.mubr.bf16.vlgmr.msra.gmra.mxu0 %v4386_v5  ;;  %v3876_v5 = vld [vmem:[#allocation8 + $0x6a8] ss:$16 sps:$4 sm:$0xff]  }
 0x1b1   :  { %2253 = vmatmul.mubr.bf16.vlgmr.msra.gmra.mxu1 %v4381_v0  ;;  %2262 = vmatpush1.bf16.msra.mxu0 %v3861_v59  ;;  %v3884_v0 = vld [vmem:[#allocation8 + $0x68c] ss:$16 sps:$4 sm:$0xff]   ;;  %v3948_v59 = vld [vmem:[#allocation8 + $0x728] ss:$16 sps:$4 sm:$0xff]  }
 0x1b2   :  { %2293 = vmatprep.mubr.bf16.mxu0 %v4399_v27  ;;  %2303 = vmatpush1.bf16.msra.mxu1 %v3864_v60  ;;  %v3882_v27 = vld [vmem:[#allocation8 + $0x688] ss:$16 sps:$4 sm:$0xff]   ;;  %v3953_v60 = vld [vmem:[#allocation8 + $0x50c] ss:$16 sps:$4 sm:$0xff]  }
 0x1b3   :  { %2334 = vmatprep.mubr.bf16.mxu1 %v4401_v31  ;;  %2263 = vmatprep.subr.bf16.mxu0 %v3869_v1  ;;  %v3885_v31 = vld [vmem:[#allocation8 + $0x468] ss:$16 sps:$4 sm:$0xff]   ;;  %v3956_v1 = vld [vmem:[#allocation8 + $0x70c] ss:$16 sps:$4 sm:$0xff]  }
 0x1b4   :  { %2304 = vmatprep.subr.bf16.mxu1 %v3872_v61  ;;  %v3951_v61 = vld [vmem:[#allocation8 + $0x508] ss:$16 sps:$4 sm:$0xff]  }
 0x1b5   :  { %2264 = vmatpush1.bf16.msra.mxu0 %v3867_v62  ;;  %v3954_v62 = vld [vmem:[#allocation8 + $0x708] ss:$16 sps:$4 sm:$0xff]  }
 0x1b6   :  { %2305 = vmatpush1.bf16.msra.mxu1 %v3870_v6  ;;  %2265 = vmatprep.subr.bf16.mxu0 %v3875_v63  ;;  %v3959_v6 = vld [vmem:[#allocation10 + $0x74] ss:$8 sps:$4 sm:$0xff]   ;;  %v3957_v63 = vld [vmem:[#allocation10 + $0x70] ss:$8 sps:$4 sm:$0xff]  }
 0x1b7   :  { %2306 = vmatprep.subr.bf16.mxu1 %v3878_v2  ;;  %v3962_v2 = vld [vmem:[#allocation10 + $0x64] ss:$8 sps:$4 sm:$0xff]  }
 0x1b9   :  { %2266 = vmatpush1.bf16.msra.mxu0 %v3873_v3 }
 0x1ba   :  { %2307 = vmatpush1.bf16.msra.mxu1 %v3876_v5  ;;  %2267 = vmatprep.subr.bf16.mxu0 %v3881_v4  ;;  %v3960_v4 = vld [vmem:[#allocation10 + $0x60] ss:$8 sps:$4 sm:$0xff]  }
 0x1bb   :  { %2308 = vmatprep.subr.bf16.mxu1 %v3884_v0 }
 0x1bd   :  { %2268 = vmatpush1.bf16.msra.mxu0 %v3879_v7  ;;  %v3965_v7 = vld [vmem:[#allocation10 + $0x54] ss:$8 sps:$4 sm:$0xff]  }
 0x1be   :  { %2309 = vmatpush1.bf16.msra.mxu1 %v3882_v27  ;;  %2269 = vmatprep.subr.bf16.mxu0 %v3887_v8 }
 0x1bf   :  { %2310 = vmatprep.subr.bf16.mxu1 %v3890_v10 }
 0x1c1   :  { %2270 = vmatpush1.bf16.msra.mxu0 %v3885_v31  ;;  %v3963_v31 = vld [vmem:[#allocation10 + $0x50] ss:$8 sps:$4 sm:$0xff]  }
 0x1c2   :  { %2311 = vmatpush1.bf16.msra.mxu1 %v3888_v11  ;;  %2271 = vmatprep.subr.bf16.mxu0 %v3893_v13 }
 0x1c3   :  { %2312 = vmatprep.subr.bf16.mxu1 %v3896_v14  ;;  %v4005_v14 = vld [vmem:[#allocation10 + $0x170] ss:$8 sps:$4 sm:$0xff]  }
 0x1c5   :  { %2272 = vmatpush1.bf16.msra.mxu0 %v3891_v15  ;;  %v4010_v15 = vld [vmem:[#allocation10 + $0x164] ss:$8 sps:$4 sm:$0xff]  }
 0x1c6   :  { %2313 = vmatpush1.bf16.msra.mxu1 %v3894_v16  ;;  %2273 = vmatprep.subr.bf16.mxu0 %v3899_v17  ;;  %v3966_v16 = vld [vmem:[#allocation10 + $0x40] ss:$8 sps:$4 sm:$0xff]   ;;  %v3971_v17 = vld [vmem:[#allocation10 + $0x34] ss:$8 sps:$4 sm:$0xff]  }
 0x1c7   :  { %2314 = vmatprep.subr.bf16.mxu1 %v3902_v18  ;;  %v4008_v18 = vld [vmem:[#allocation10 + $0x160] ss:$8 sps:$4 sm:$0xff]  }
 0x1c9   :  { %2274 = vmatpush1.bf16.msra.mxu0 %v3897_v19  ;;  %v4013_v19 = vld [vmem:[#allocation10 + $0x154] ss:$8 sps:$4 sm:$0xff]  }
 0x1ca   :  { %2315 = vmatpush1.bf16.msra.mxu1 %v3900_v20  ;;  %2275 = vmatprep.subr.bf16.mxu0 %v3905_v21  ;;  %v3969_v20 = vld [vmem:[#allocation10 + $0x30] ss:$8 sps:$4 sm:$0xff]   ;;  %v3974_v21 = vld [vmem:[#allocation10 + $0x24] ss:$8 sps:$4 sm:$0xff]  }
 0x1cb   :  { %2316 = vmatprep.subr.bf16.mxu1 %v3908_v22  ;;  %v4011_v22 = vld [vmem:[#allocation10 + $0x150] ss:$8 sps:$4 sm:$0xff]  }
 0x1cd   :  { %2276 = vmatpush1.bf16.msra.mxu0 %v3903_v23  ;;  %v4016_v23 = vld [vmem:[#allocation10 + $0x144] ss:$8 sps:$4 sm:$0xff]  }
 0x1ce   :  { %2317 = vmatpush1.bf16.msra.mxu1 %v3906_v24  ;;  %2277 = vmatprep.subr.bf16.mxu0 %v3911_v25  ;;  %v3972_v24 = vld [vmem:[#allocation10 + $0x20] ss:$8 sps:$4 sm:$0xff]   ;;  %v3977_v25 = vld [vmem:[#allocation10 + $0x14] ss:$8 sps:$4 sm:$0xff]  }
 0x1cf   :  { %2318 = vmatprep.subr.bf16.mxu1 %v3914_v26  ;;  %v4014_v26 = vld [vmem:[#allocation10 + $0x140] ss:$8 sps:$4 sm:$0xff]  }
 0x1d1   :  { %2278 = vmatpush2.bf16.msra.mxu0 %v3909_v28  ;;  %v4019_v28 = vld [vmem:[#allocation10 + $0x134] ss:$8 sps:$4 sm:$0xff]  }
 0x1d2   :  { %2319 = vmatpush2.bf16.msra.mxu1 %v3912_v29  ;;  %2279 = vmatprep.subr.bf16.mxu0 %v3917_v30  ;;  %v3975_v29 = vld [vmem:[#allocation10 + $0x10] ss:$8 sps:$4 sm:$0xff]   ;;  %v3980_v30 = vld [vmem:[#allocation10 + $0x4] ss:$8 sps:$4 sm:$0xff]  }
 0x1d3   :  { %2320 = vmatprep.subr.bf16.mxu1 %v3920_v32  ;;  %v4017_v32 = vld [vmem:[#allocation10 + $0x130] ss:$8 sps:$4 sm:$0xff]  }
 0x1d5   :  { %2280 = vmatpush2.bf16.msra.mxu0 %v3915_v33  ;;  %v4022_v33 = vld [vmem:[#allocation10 + $0x124] ss:$8 sps:$4 sm:$0xff]  }
 0x1d6   :  { %2321 = vmatpush2.bf16.msra.mxu1 %v3918_v34  ;;  %2281 = vmatprep.subr.bf16.mxu0 %v3923_v35  ;;  %v3978_v34 = vld [vmem:[#allocation10] ss:$8 sps:$4 sm:$0xff]   ;;  %v3983_v35 = vld [vmem:[#allocation10 + $0xf4] ss:$8 sps:$4 sm:$0xff]  }
 0x1d7   :  { %2322 = vmatprep.subr.bf16.mxu1 %v3926_v36  ;;  %v4020_v36 = vld [vmem:[#allocation10 + $0x120] ss:$8 sps:$4 sm:$0xff]  }
 0x1d9   :  { %2282 = vmatpush2.bf16.msra.mxu0 %v3921_v43  ;;  %v4025_v43 = vld [vmem:[#allocation10 + $0x114] ss:$8 sps:$4 sm:$0xff]  }
 0x1da   :  { %2323 = vmatpush2.bf16.msra.mxu1 %v3924_v39  ;;  %2283 = vmatprep.subr.bf16.mxu0 %v3929_v44  ;;  %v3981_v39 = vld [vmem:[#allocation10 + $0xf0] ss:$8 sps:$4 sm:$0xff]   ;;  %v3986_v44 = vld [vmem:[#allocation10 + $0xe4] ss:$8 sps:$4 sm:$0xff]  }
 0x1db   :  { %2324 = vmatprep.subr.bf16.mxu1 %v3932_v45  ;;  %v4023_v45 = vld [vmem:[#allocation10 + $0x110] ss:$8 sps:$4 sm:$0xff]  }
 0x1dd   :  { %2284 = vmatpush2.bf16.msra.mxu0 %v3927_v46  ;;  %v4028_v46 = vld [vmem:[#allocation10 + $0x104] ss:$8 sps:$4 sm:$0xff]  }
 0x1de   :  { %2325 = vmatpush2.bf16.msra.mxu1 %v3930_v12  ;;  %2285 = vmatprep.subr.bf16.mxu0 %v3935_v9  ;;  %v3984_v12 = vld [vmem:[#allocation10 + $0xe0] ss:$8 sps:$4 sm:$0xff]   ;;  %v3989_v9 = vld [vmem:[#allocation10 + $0xd4] ss:$8 sps:$4 sm:$0xff]  }
 0x1df   :  { %2326 = vmatprep.subr.bf16.mxu1 %v3938_v49  ;;  %v4026_v49 = vld [vmem:[#allocation10 + $0x100] ss:$8 sps:$4 sm:$0xff]  }
 0x1e1   :  { %2286 = vmatpush2.bf16.msra.mxu0 %v3933_v50  ;;  %v4031_v50 = vld [vmem:[#allocation10 + $0x1f4] ss:$8 sps:$4 sm:$0xff]  }
 0x1e2   :  { %2327 = vmatpush2.bf16.msra.mxu1 %v3936_v51  ;;  %2287 = vmatprep.subr.bf16.mxu0 %v3941_v52  ;;  %v3987_v51 = vld [vmem:[#allocation10 + $0xd0] ss:$8 sps:$4 sm:$0xff]   ;;  %v3992_v52 = vld [vmem:[#allocation10 + $0xc4] ss:$8 sps:$4 sm:$0xff]  }
 0x1e3   :  { %2328 = vmatprep.subr.bf16.mxu1 %v3944_v53  ;;  %v4029_v53 = vld [vmem:[#allocation10 + $0x1f0] ss:$8 sps:$4 sm:$0xff]  }
 0x1e5   :  { %2288 = vmatpush2.bf16.msra.mxu0 %v3939_v54  ;;  %v4034_v54 = vld [vmem:[#allocation10 + $0x1e4] ss:$8 sps:$4 sm:$0xff]  }
 0x1e6   :  { %2329 = vmatpush2.bf16.msra.mxu1 %v3942_v55  ;;  %2289 = vmatprep.subr.bf16.mxu0 %v3947_v56  ;;  %v3990_v55 = vld [vmem:[#allocation10 + $0xc0] ss:$8 sps:$4 sm:$0xff]   ;;  %v3995_v56 = vld [vmem:[#allocation10 + $0xb4] ss:$8 sps:$4 sm:$0xff]  }
 0x1e7   :  { %2330 = vmatprep.subr.bf16.mxu1 %v3950_v57  ;;  %v4032_v57 = vld [vmem:[#allocation10 + $0x1e0] ss:$8 sps:$4 sm:$0xff]  }
 0x1e9   :  { %2290 = vmatpush2.bf16.msra.mxu0 %v3945_v58  ;;  %v4037_v58 = vld [vmem:[#allocation10 + $0x1d4] ss:$8 sps:$4 sm:$0xff]  }
 0x1ea   :  { %2331 = vmatpush2.bf16.msra.mxu1 %v3948_v59  ;;  %2291 = vmatprep.subr.bf16.mxu0 %v3953_v60  ;;  %v3993_v59 = vld [vmem:[#allocation10 + $0xb0] ss:$8 sps:$4 sm:$0xff]   ;;  %v3998_v60 = vld [vmem:[#allocation10 + $0xa4] ss:$8 sps:$4 sm:$0xff]  }
 0x1eb   :  { %2332 = vmatprep.subr.bf16.mxu1 %v3956_v1  ;;  %v4035_v1 = vld [vmem:[#allocation10 + $0x1d0] ss:$8 sps:$4 sm:$0xff]  }
 0x1ed   :  { %2292 = vmatpush2.bf16.msra.mxu0 %v3951_v61  ;;  %v4040_v61 = vld [vmem:[#allocation10 + $0x1c4] ss:$8 sps:$4 sm:$0xff]  }
 0x1ee   :  { %2333 = vmatpush2.bf16.msra.mxu1 %v3954_v62  ;;  %2746 = vmatprep.subr.bf16.mxu0 %v3959_v6  ;;  %v3996_v62 = vld [vmem:[#allocation10 + $0xa0] ss:$8 sps:$4 sm:$0xff]   ;;  %v4001_v6 = vld [vmem:[#allocation10 + $0x94] ss:$8 sps:$4 sm:$0xff]  }
 0x1f0   :  { %2294 = vmatmul.mubr.bf16.vlgmr.msra.gmra.mxu0 %v4413_v48  ;;  %v4424_v3 = vpop.f32.mrf.mxu0  ;;  %v4427_v5 = vpop.f32.mrf.mxu1  ;;  %v3968_v48 = vld [vmem:[#allocation10 + $0x44] ss:$8 sps:$4 sm:$0xff]  }
 0x1f1   :  { %2335 = vmatmul.mubr.bf16.vlgmr.msra.gmra.mxu1 %v4411_v47  ;;  %2747 = vmatpush1.bf16.msra.mxu0 %v3957_v63  ;;  %v4007_v47 = vld [vmem:[#allocation10 + $0x174] ss:$8 sps:$4 sm:$0xff]   ;;  %v4038_v63 = vld [vmem:[#allocation10 + $0x1c0] ss:$8 sps:$4 sm:$0xff]  }
 0x1f2   :  { %v4429_v0 = vpop.f32.mrf.mxu0  ;;  %2748 = vmatprep.subr.bf16.mxu0 %v3962_v2  ;;  %v4431_v27 = vpop.f32.mrf.mxu1  ;;  %2787 = vmatprep.subr.bf16.mxu1 %v4007_v47  ;;  %v4043_v2 = vld [vmem:[#allocation10 + $0x1b4] ss:$8 sps:$4 sm:$0xff]  }
 0x1f3   :  { %2788 = vmatpush1.bf16.msra.mxu1 %v4005_v14 }
 0x1f4   :  { %v2053_v8 = vpop.f32.mrf.mxu0  ;;  %v2094_v10 = vpop.f32.mrf.mxu1  ;;  %2789 = vmatprep.subr.bf16.mxu1 %v4010_v15 }
 0x1f5   :  { %2749 = vmatpush1.bf16.msra.mxu0 %v3960_v4  ;;  %v4436_v4 = vld [vmem:[%s4470_s4] sm:$0xf]  ;;  %v4004_v8 = vld [vmem:[#allocation10 + $0x84] ss:$8 sps:$4 sm:$0xff]   ;;  %v4041_v10 = vld [vmem:[#allocation10 + $0x1b0] ss:$8 sps:$4 sm:$0xff]  }
 0x1f6   :  { %v2054_v11 = vpop.f32.mrf.mxu0  ;;  %2750 = vmatprep.subr.bf16.mxu0 %v3965_v7  ;;  %v2095_v13 = vpop.f32.mrf.mxu1  ;;  %v3999_v7 = vld [vmem:[#allocation10 + $0x90] ss:$8 sps:$4 sm:$0xff]  }
 0x1f7   :  { %2790 = vmatpush1.bf16.msra.mxu1 %v4008_v18  ;;  %v722_v11 = vrot.slane %v4436_v4, %v4366_v41 }
 0x1f8   :  { %2791 = vmatprep.subr.bf16.mxu1 %v4013_v19 }
 0x1f9   :  { %2751 = vmatpush1.bf16.msra.mxu0 %v3963_v31  ;;  %v718_v31 = vrot.slane %v4436_v4, %v4360_v38  ;;  %v2052_v14 = vadd.f32 %v4429_v0, %v722_v11 }
 0x1fa   :  { %2752 = vmatprep.subr.bf16.mxu0 %v3968_v48  ;;  %v4002_v48 = vld [vmem:[#allocation10 + $0x80] ss:$8 sps:$4 sm:$0xff]  }
 0x1fb   :  { %2792 = vmatpush1.bf16.msra.mxu1 %v4011_v22  ;;  %v2050_v13 = vadd.f32 %v4424_v3, %v718_v31  ;;  %v4049_v3 = vld [vmem:[#allocation10 + $0x194] ss:$8 sps:$4 sm:$0xff]  }
 0x1fc   :  { %2793 = vmatprep.subr.bf16.mxu1 %v4016_v23 }
 0x1fd   :  { %2753 = vmatpush1.bf16.msra.mxu0 %v3966_v16  ;;  %v2091_v47 = vadd.f32 %v4427_v5, %v2050_v13  ;;  %v4046_v16 = vld [vmem:[#allocation10 + $0x1a4] ss:$8 sps:$4 sm:$0xff]  }
 0x1fe   :  { %2754 = vmatprep.subr.bf16.mxu0 %v3971_v17  ;;  %v2093_v17 = vadd.f32 %v4431_v27, %v2052_v14  ;;  %v4052_v27 = vld [vmem:[#allocation10 + $0x184] ss:$8 sps:$4 sm:$0xff]  }
 0x1ff   :  { %2794 = vmatpush1.bf16.msra.mxu1 %v4014_v26 }
 0x200   :  { %2795 = vmatprep.subr.bf16.mxu1 %v4019_v28  ;;  %v4047_v28 = vld [vmem:[#allocation10 + $0x190] ss:$8 sps:$4 sm:$0xff]  }
 0x201   :  { %2755 = vmatpush1.bf16.msra.mxu0 %v3969_v20  ;;  %v4044_v20 = vld [vmem:[#allocation10 + $0x1a0] ss:$8 sps:$4 sm:$0xff]  }
 0x202   :  { %2756 = vmatprep.subr.bf16.mxu0 %v3974_v21 }
 0x203   :  { %2796 = vmatpush1.bf16.msra.mxu1 %v4017_v32 }
 0x204   :  { %2797 = vmatprep.subr.bf16.mxu1 %v4022_v33 }
 0x205   :  { %2757 = vmatpush1.bf16.msra.mxu0 %v3972_v24 }
 0x206   :  { %2758 = vmatprep.subr.bf16.mxu0 %v3977_v25 }
 0x207   :  { %2798 = vmatpush1.bf16.msra.mxu1 %v4020_v36 }
 0x208   :  { %2799 = vmatprep.subr.bf16.mxu1 %v4025_v43 }
 0x209   :  { %2759 = vmatpush1.bf16.msra.mxu0 %v3975_v29 }
 0x20a   :  { %2760 = vmatprep.subr.bf16.mxu0 %v3980_v30 }
 0x20b   :  { %2800 = vmatpush1.bf16.msra.mxu1 %v4023_v45 }
 0x20c   :  { %2801 = vmatprep.subr.bf16.mxu1 %v4028_v46 }
 0x20d   :  { %2761 = vmatpush1.bf16.msra.mxu0 %v3978_v34  ;;  %v4050_v34 = vld [vmem:[#allocation10 + $0x180] ss:$8 sps:$4 sm:$0xff]  }
 0x20e   :  { %2762 = vmatprep.subr.bf16.mxu0 %v3983_v35 }
 0x20f   :  { %2802 = vmatpush1.bf16.msra.mxu1 %v4026_v49  ;;  %v4053_v49 = vld [vmem:[#allocation11 + $0x78] sm:$0xff]  }
 0x210   :  { %2803 = vmatprep.subr.bf16.mxu1 %v4031_v50  ;;  %v4054_v50 = vld [vmem:[#allocation11 + $0x38] sm:$0xff]  }
 0x211   :  { %2763 = vmatpush2.bf16.msra.mxu0 %v3981_v39 }
 0x212   :  { %2764 = vmatprep.subr.bf16.mxu0 %v3986_v44 }
 0x213   :  { %2804 = vmatpush2.bf16.msra.mxu1 %v4029_v53  ;;  %v4057_v53 = vld [vmem:[#allocation11 + $0x68] sm:$0xff]  }
 0x214   :  { %2805 = vmatprep.subr.bf16.mxu1 %v4034_v54  ;;  %v4058_v54 = vld [vmem:[#allocation11 + $0x28] sm:$0xff]  }
 0x215   :  { %2765 = vmatpush2.bf16.msra.mxu0 %v3984_v12 }
 0x216   :  { %2766 = vmatprep.subr.bf16.mxu0 %v3989_v9 }
 0x217   :  { %2806 = vmatpush2.bf16.msra.mxu1 %v4032_v57  ;;  %v4061_v57 = vld [vmem:[#allocation11 + $0x58] sm:$0xff]  }
 0x218   :  { %2807 = vmatprep.subr.bf16.mxu1 %v4037_v58  ;;  %v4062_v58 = vld [vmem:[#allocation11 + $0x18] sm:$0xff]  }
 0x219   :  { %2767 = vmatpush2.bf16.msra.mxu0 %v3987_v51  ;;  %v4055_v51 = vld [vmem:[#allocation11 + $0x70] sm:$0xff]  }
 0x21a   :  { %2768 = vmatprep.subr.bf16.mxu0 %v3992_v52  ;;  %v4056_v52 = vld [vmem:[#allocation11 + $0x30] sm:$0xff]  }
 0x21b   :  { %2808 = vmatpush2.bf16.msra.mxu1 %v4035_v1  ;;  %v726_v1 = vrot.slane %v4436_v4, %v164_v40 }
 0x21c   :  { %2809 = vmatprep.subr.bf16.mxu1 %v4040_v61  ;;  %v730_v61 = vrot.slane %v4436_v4, %v168_v42 }
 0x21d   :  { %2769 = vmatpush2.bf16.msra.mxu0 %v3990_v55  ;;  %v4059_v55 = vld [vmem:[#allocation11 + $0x60] sm:$0xff]  }
 0x21e   :  { %2770 = vmatprep.subr.bf16.mxu0 %v3995_v56  ;;  %v4060_v56 = vld [vmem:[#allocation11 + $0x20] sm:$0xff]  }
 0x21f   :  { %2810 = vmatpush2.bf16.msra.mxu1 %v4038_v63 }
 0x220   :  { %2811 = vmatprep.subr.bf16.mxu1 %v4043_v2 }
 0x221   :  { %2771 = vmatpush2.bf16.msra.mxu0 %v3993_v59  ;;  %v4063_v59 = vld [vmem:[#allocation11 + $0x50] sm:$0xff]  }
 0x222   :  { %2772 = vmatprep.subr.bf16.mxu0 %v3998_v60  ;;  %v4064_v60 = vld [vmem:[#allocation11 + $0x10] sm:$0xff]  }
 0x223   :  { %2812 = vmatpush2.bf16.msra.mxu1 %v4041_v10 }
 0x224   :  { %2813 = vmatprep.subr.bf16.mxu1 %v4046_v16 }
 0x225   :  { %2773 = vmatpush2.bf16.msra.mxu0 %v3996_v62 }
 0x226   :  { %2774 = vmatprep.subr.bf16.mxu0 %v4001_v6 }
 0x227   :  { %2814 = vmatpush2.bf16.msra.mxu1 %v4044_v20  ;;  %v4065_v20 = vld [vmem:[#allocation11 + $0x48] sm:$0xff]  }
 0x228   :  { %2815 = vmatprep.subr.bf16.mxu1 %v4049_v3  ;;  %v4069_v3 = vld [vmem:[#allocation13 + $0x38] sm:$0xff]  }
 0x229   :  { %2775 = vmatpush2.bf16.msra.mxu0 %v3999_v7 }
 0x22a   :  { %2776 = vmatprep.subr.bf16.mxu0 %v4004_v8 }
 0x22b   :  { %2816 = vmatpush2.bf16.msra.mxu1 %v4047_v28  ;;  %v4071_v28 = vld [vmem:[#allocation13 + $0x28] sm:$0xff]  }
 0x22c   :  { %2817 = vmatprep.subr.bf16.mxu1 %v4052_v27 }
 0x22d   :  { %2777 = vmatpush2.bf16.msra.mxu0 %v4002_v48 }
 0x22e   :  { %3503 = vmatprep.subr.bf16.mxu0 %v4053_v49 }
 0x22f   :  { %2818 = vmatpush2.bf16.msra.mxu1 %v4050_v34 }
 0x230   :  { %v2131_v15 = vpop.f32.mrf.mxu0  ;;  %v2172_v19 = vpop.f32.mrf.mxu1 }
 0x231   :  { %v2132_v18 = vadd.f32 %v2131_v15, %v2091_v47 }
 0x232   :  { %v2133_v21 = vpop.f32.mrf.mxu0  ;;  %v2174_v24 = vpop.f32.mrf.mxu1 }
 0x233   :  { %v2173_v22 = vadd.f32 %v2172_v19, %v2132_v18  ;;  %v2134_v23 = vadd.f32 %v2133_v21, %v2093_v17  ;;  %v4066_v21 = vld [vmem:[#allocation11 + $0x8] sm:$0xff]  }
 0x234   :  { %v2135_v25 = vpop.f32.mrf.mxu0  ;;  %v2176_v0 = vpop.f32.mrf.mxu1 }
 0x235   :  { %v2175_v26 = vadd.f32 %v2174_v24, %v2134_v23  ;;  %v2343_v29 = vmax.f32 %v2173_v22, 0.0  ;;  %v4067_v24 = vld [vmem:[#allocation11 + $0x40] sm:$0xff]   ;;  %v4070_v0 = vld [vmem:[#allocation13 + $0x30] sm:$0xff]  }
 0x236   :  { %v2136_v5 = vpop.f32.mrf.mxu0  ;;  %v2177_v32 = vpop.f32.mrf.mxu1  ;;  %v4068_v25 = vld [vmem:[#allocation11] sm:$0xff]  }
 0x237   :  { %v2344_v30 = vmax.f32 %v2175_v26, 0.0  ;;  %v2347_v35 = vpack.c.bf16 %v2343_v29, %v2343_v29  ;;  %v4263_v26 = vmov 0.0   ;;  %v4072_v29 = vld [vmem:[#allocation13 + $0x20] sm:$0xff]   ;;  %v4073_v5 = vld [vmem:[#allocation13 + $0x18] sm:$0xff]  }
 0x238   :  { %3534 = vmatprep.subr.bf16.mxu1 %v4263_v26 }
 0x239   :  { %v2348_v33 = vpack.c.bf16 %v2344_v30, %v2344_v30  ;;  %v133_v30 = vld [vmem:[%s4472_s6] sm:$0x3] }
 0x23a   :  { %v2419_v32 = vrot.slane %v133_v30, %v4360_v38  ;;  %v2423_v27 = vrot.slane %v133_v30, %v4366_v41  ;;  %v4075_v38 = vld [vmem:[#allocation13 + $0x8] sm:$0xff]   ;;  %v4076_v41 = vld [vmem:[#allocation13] sm:$0xff]  }
 0x23b   :  { %2778 = vmatprep.mubr.bf16.mxu0 %v2348_v33 }
 0x23c   :  { %2779 = vmatmul.mubr.bf16.vlgmr.msra.gmra.mxu0 %v2347_v35 }
 0x23d   :  { %3504 = vmatpush3.bf16.msra.mxu0 %v4054_v50  ;;  %v4074_v50 = vld [vmem:[#allocation13 + $0x10] sm:$0xff]  }
 0x23e   :  { %3505 = vmatprep.subr.bf16.mxu0 %v4055_v51 }
 0x241   :  { %3506 = vmatpush3.bf16.msra.mxu0 %v4056_v52  ;;  %v3477_v52 = vld [vmem:[%s4474_s8] ss:$0 sm:$0xff]  ;;  %s4217_s8 = scalar_lea.vmem %s3126_s20, 128 }
 0x242   :  { %3507 = vmatprep.subr.bf16.mxu0 %v4057_v53  ;;  %p4218_p7 = scmp.ne.s32.totalorder %s3126_s20, %s4217_s8  ;;  %p4223_p9 = scmp.lt.s32.totalorder %s4217_s8, %s4217_s8 }
 0x244   :  { %p4224_p10 = por %p4223_p9, %p4222_p8 }
 0x245   :  { %3508 = vmatpush3.bf16.msra.mxu0 %v4058_v54 }
 0x246   :  { %3509 = vmatprep.subr.bf16.mxu0 %v4059_v55  ;;  %p4225_p11 = pnand %p4224_p10, %p4218_p7 }
 0x249   :  { %3510 = vmatpush3.bf16.msra.mxu0 %v4060_v56 }
 0x24a   :  { %3511 = vmatprep.subr.bf16.mxu0 %v4061_v57 }
 0x24d   :  { %3512 = vmatpush3.bf16.msra.mxu0 %v4062_v58 }
 0x24e   :  { %3513 = vmatprep.subr.bf16.mxu0 %v4063_v59 }
 0x251   :  { %3514 = vmatpush3.bf16.msra.mxu0 %v4064_v60  ;;  %v3494_v60 = vld [vmem:[%s4476_s10] ss:$0 sm:$0xff] }
 0x252   :  { %3515 = vmatprep.subr.bf16.mxu0 %v4065_v20 }
 0x255   :  { %3516 = vmatpush3.bf16.msra.mxu0 %v4066_v21 }
 0x256   :  { %3517 = vmatprep.subr.bf16.mxu0 %v4067_v24 }
 0x259   :  { %3518 = vmatpush3.bf16.msra.mxu0 %v4068_v25 }
 0x270   :  { %v2213_v36 = vpop.f32.mrf.mxu0 }
 0x271   :  { %v2254_v43 = vpop.f32.mrf.mxu1  ;;  %v2214_v62 = vadd.f32 %v2213_v36, %v726_v1 }
 0x272   :  { %v2215_v39 = vpop.f32.mrf.mxu0 }
 0x273   :  { %v2256_v44 = vpop.f32.mrf.mxu1  ;;  %v2216_v6 = vadd.f32 %v2215_v39, %v730_v61  ;;  %v2255_v63 = vadd.f32 %v2254_v43, %v2214_v62 }
 0x274   :  { %v2217_v45 = vpop.f32.mrf.mxu0 }
 0x275   :  { %v2258_v46 = vpop.f32.mrf.mxu1  ;;  %v2257_v7 = vadd.f32 %v2256_v44, %v2216_v6 }
 0x276   :  { %v2218_v12 = vpop.f32.mrf.mxu0 }
 0x277   :  { %v2259_v9 = vpop.f32.mrf.mxu1 }
 0x2b0   :  { %v2295_v2 = vpop.f32.mrf.mxu0 }
 0x2b1   :  { %v2296_v8 = vadd.f32 %v2295_v2, %v2255_v63  ;;  %v2336_v10 = vpop.f32.mrf.mxu1 }
 0x2b2   :  { %v2297_v31 = vpop.f32.mrf.mxu0 }
 0x2b3   :  { %v2337_v11 = vadd.f32 %v2336_v10, %v2296_v8  ;;  %v2298_v48 = vadd.f32 %v2297_v31, %v2257_v7  ;;  %v2338_v13 = vpop.f32.mrf.mxu1 }
 0x2b4   :  { %v2299_v14 = vpop.f32.mrf.mxu0 }
 0x2b5   :  { %v2339_v47 = vadd.f32 %v2338_v13, %v2298_v48  ;;  %v2340_v15 = vpop.f32.mrf.mxu1  ;;  %v2345_v16 = vmax.f32 %v2337_v11, 0.0 }
 0x2b6   :  { %v2300_v40 = vpop.f32.mrf.mxu0 }
 0x2b7   :  { %v2346_v17 = vmax.f32 %v2339_v47, 0.0  ;;  %v2341_v37 = vpop.f32.mrf.mxu1  ;;  %v2349_v42 = vpack.c.bf16 %v2345_v16, %v2345_v16 }
 0x2b9   :  { %v2350_v18 = vpack.c.bf16 %v2346_v17, %v2346_v17 }
 0x2bb   :  { %2819 = vmatprep.mubr.bf16.mxu1 %v2350_v18 }
 0x2bc   :  { %2820 = vmatmul.mubr.bf16.vlgmr.msra.gmra.mxu1 %v2349_v42 }
 0x2bd   :  { %3535 = vmatpush3.bf16.msra.mxu1 %v4069_v3  ;;  %3550 = vmatprep.mubr.msk.bf16.mxu1 %vm4264_vm1, %v4263_v26 }
 0x2be   :  { %3536 = vmatprep.subr.bf16.mxu1 %v4263_v26 }
 0x2c1   :  { %3537 = vmatpush3.bf16.msra.mxu1 %v4070_v0 }
 0x2c2   :  { %3538 = vmatprep.subr.bf16.mxu1 %v4263_v26 }
 0x2c5   :  { %3539 = vmatpush3.bf16.msra.mxu1 %v4071_v28 }
 0x2c6   :  { %3540 = vmatprep.subr.bf16.mxu1 %v4263_v26 }
 0x2c9   :  { %3541 = vmatpush3.bf16.msra.mxu1 %v4072_v29 }
 0x2ca   :  { %3542 = vmatprep.subr.bf16.mxu1 %v4263_v26 }
 0x2cd   :  { %3543 = vmatpush3.bf16.msra.mxu1 %v4073_v5 }
 0x2ce   :  { %3544 = vmatprep.subr.bf16.mxu1 %v4263_v26 }
 0x2d1   :  { %3545 = vmatpush3.bf16.msra.mxu1 %v4074_v50 }
 0x2d2   :  { %3546 = vmatprep.subr.bf16.mxu1 %v4263_v26 }
 0x2d5   :  { %3547 = vmatpush3.bf16.msra.mxu1 %v4075_v38 }
 0x2d6   :  { %3548 = vmatprep.subr.bf16.mxu1 %v4263_v26 }
 0x2d9   :  { %3549 = vmatpush3.bf16.msra.mxu1 %v4076_v41 }
 0x2fc   :  { %v2780_v4 = vpop.f32.mrf.mxu0 }
 0x2fd   :  { %v2781_v33 = vadd.f32 %v2780_v4, %v2419_v32 }
 0x2fe   :  { %v2782_v19 = vpop.f32.mrf.mxu0 }
 0x2ff   :  { %v2783_v35 = vadd.f32 %v2782_v19, %v2423_v27 }
 0x300   :  { %v2784_v22 = vpop.f32.mrf.mxu0 }
 0x302   :  { %v2785_v23 = vpop.f32.mrf.mxu0 }
 0x37c   :  { %v2821_v34 = vpop.f32.mrf.mxu1 }
 0x37d   :  { %v2822_v36 = vadd.f32 %v2821_v34, %v2781_v33 }
 0x37e   :  { %v2823_v43 = vpop.f32.mrf.mxu1 }
 0x37f   :  { %v2824_v39 = vadd.f32 %v2823_v43, %v2783_v35  ;;  %v2828_v44 = vmax.f32 %v2822_v36, 0.0 }
 0x380   :  { %v2825_v45 = vpop.f32.mrf.mxu1 }
 0x381   :  { %v2829_v46 = vmax.f32 %v2824_v39, 0.0  ;;  %v2830_v49 = vpack.c.bf16 %v2828_v44, %v2828_v44 }
 0x382   :  { %v2826_v12 = vpop.f32.mrf.mxu1 }
 0x383   :  { %v2831_v9 = vpack.c.bf16 %v2829_v46, %v2829_v46 }
 0x385   :  { %2998 = vmatprep.mubr.bf16.mxu0 %v2831_v9 }
 0x386   :  { %2999 = vmatmul.mubr.bf16.vlgmr.msra.gmra.mxu0 %v2830_v49 }
 0x446   :  { %v3519_v51 = vpop.f32.mrf.mxu0 }
 0x448   :  { %v3520_v53 = vpop.f32.mrf.mxu0 }
 0x449   :  { %v3521_v54 = vadd.f32 %v3520_v53, %v3519_v51 }
 0x44a   :  { %v3522_v55 = vpop.f32.mrf.mxu0 }
 0x44b   :  { %v3001_v56 = vadd.f32 %v3521_v54, %v3477_v52 }
 0x44c   :  { %v3523_v57 = vpop.f32.mrf.mxu0 }
 0x44d   :  { %v3006_v58 = vmax.f32 %v3001_v56, 0.0 }
 0x44f   :  { %v3007_v59 = vpack.c.bf16 %v3006_v58, %v3006_v58 }
 0x451   :  { %3551 = vmatmul.mubr.bf16.vlgmr.msra.gmra.mxu1 %v3007_v59 }
 0x511   :  { %v3112_v1 = vpop.f32.mrf.mxu1 }
 0x512   :  { %v3113_v61 = vadd.f32 %v3494_v60, %v3112_v1 }
 0x513   :  { %v3552_v62 = vpop.f32.mrf.mxu1 }
 0x514   :  { %3118 = vst [vmem:[#allocation14] sm:$0xff] %v3113_v61 }
 0x515   :  { %v3115_v6 = vpop.f32.mrf.mxu1 }
 0x516   :  { %4228 = shalt.err (!%p4225_p11)
}
 0x517   :  { %3128 = dma.vmem_to_hbm [thread:$0]  %s3126_s20, 128, %s4477_s11, [#allocation4]   ;;  %v3553_v63 = vpop.f32.mrf.mxu1 }
 0x518   :  { %4245 = dma.done.wait [#allocation4], 128  }
 0x519   :  { %4246 = vsyncadd [#allocation4], 4294967168 }
 0x51a   :  { %3132 = vsyncpa [#allocation3], 1 }
 0x51b   :  { %3133 = vsyncpa [#allocation6], 1 }
 0x51c   :  { %3134 = vsyncpa [#allocation9], 1 }
 0x51d   :  { %3135 = vsyncpa [#allocation12], 1 }
 0x51e   :  { %3136 = vsyncpa [#allocation4], 1 }

</bundles_post_ra>
